<compile_context>
chip_gen: v7x
topology: tpu7x:2x2x1
jax: 0.10.0
libtpu: 0.0.40
codegen_flags: <defaults>
</compile_context>

<pallas_src>
import functools

import jax
import jax.numpy as jnp
from jax import lax
from jax.experimental import pallas as pl
from jax.experimental.pallas import tpu as pltpu


LANES = 128   # pad channel dims to the 128-lane vreg width
HALO = 8      # sublane-aligned halo rows (>= (K-1)//2); keeps scratch writes 8-aligned


# --------------------------------------------------------------------------
# Fused kernel: whole Postnet stack for one batch element.
# --------------------------------------------------------------------------
def postnet_fused_kernel(x_ref, w_ref, ss_ref, o_ref, buf_a, buf_b,
                         *, num_layers, K, T, pad):
    # x_ref:  (1, T, C)      channel-padded input for this batch element
    # w_ref:  (L, K*C, C)    im2col-reshaped, channel-padded conv weights
    # ss_ref: (L, 2, C)      folded BN (scale, shift) per layer
    # o_ref:  (1, T, C)      channel-padded output
    # buf_a/buf_b: (T + 2*HALO, C) f32 ping-pong activation buffers in VMEM
    start = HALO - pad

    # Zero once: the halo rows supply SAME padding for every layer; the body
    # rows [HALO : HALO+T] are always overwritten before being read.
    buf_a[...] = jnp.zeros_like(buf_a)
    buf_b[...] = jnp.zeros_like(buf_b)
    buf_a[HALO:HALO + T, :] = x_ref[0].astype(jnp.float32)

    bufs = (buf_a, buf_b)
    for l in range(num_layers):               # static unroll over the 5 layers
        src = bufs[l % 2]
        # im2col: one (T, K*C) @ (K*C, C) MXU matmul per layer.
        cols = jnp.concatenate(
            [src[start + k:start + k + T, :] for k in range(K)], axis=-1)
        acc = jnp.dot(cols, w_ref[l], preferred_element_type=jnp.float32)
        ss = ss_ref[l]                        # (2, C): row 0 = scale, row 1 = shift
        acc = acc * ss[0:1, :] + ss[1:2, :]
        if l < num_layers - 1:
            bufs[(l + 1) % 2][HALO:HALO + T, :] = jnp.tanh(acc)
        else:
            o_ref[0] = acc.astype(o_ref.dtype)


def postnet_forward(x, w_all, ss_all, mel_dim):
    """x: (B, T, mel_dim) -> (B, T, mel_dim). Whole 5-layer stack in one call."""
    B, T, cin = x.shape
    L, KC, C = w_all.shape
    K = KC // C
    pad = (K - 1) // 2

    x_p = jnp.pad(x, ((0, 0), (0, 0), (0, C - cin)))    # single channel-pad op

    kernel = functools.partial(postnet_fused_kernel,
                               num_layers=L, K=K, T=T, pad=pad)
    out = pl.pallas_call(
        kernel,
        out_shape=jax.ShapeDtypeStruct((B, T, C), x.dtype),
        grid=(B,),
        in_specs=[
            pl.BlockSpec((1, T, C), lambda b: (b, 0, 0)),
            pl.BlockSpec((L, K * C, C), lambda b: (0, 0, 0)),
            pl.BlockSpec((L, 2, C), lambda b: (0, 0, 0)),
        ],
        out_specs=pl.BlockSpec((1, T, C), lambda b: (b, 0, 0)),
        scratch_shapes=[
            pltpu.VMEM((T + 2 * HALO, C), jnp.float32),
            pltpu.VMEM((T + 2 * HALO, C), jnp.float32),
        ],
        compiler_params=pltpu.CompilerParams(
            dimension_semantics=("parallel",)),
    )(x_p, w_all, ss_all)
    return out[:, :, :mel_dim]


# --------------------------------------------------------------------------
# Parameter construction (deterministic, synthetic) and packing for the kernel.
# --------------------------------------------------------------------------
def make_postnet_params(key, mel_dim, conv_channels, num_convs, kernel_size,
                        eps=1e-5):
    """Builds [(w, scale, shift, apply_tanh), ...] with BN folded to affine."""
    out_channels = [conv_channels] * (num_convs - 1) + [mel_dim]
    in_channels = [mel_dim] + out_channels[:-1]
    params = []
    for i, (cin, cout) in enumerate(zip(in_channels, out_channels)):
        key, k_w, k_g, k_b, k_m, k_v = jax.random.split(key, 6)
        w = jax.random.normal(k_w, (kernel_size, cin, cout), jnp.float32) * 0.1
        gamma = 1.0 + 0.1 * jax.random.normal(k_g, (cout,), jnp.float32)
        beta = 0.1 * jax.random.normal(k_b, (cout,), jnp.float32)
        run_mean = 0.1 * jax.random.normal(k_m, (cout,), jnp.float32)
        run_var = jnp.abs(jax.random.normal(k_v, (cout,), jnp.float32)) + 0.5
        scale = gamma / jnp.sqrt(run_var + eps)
        shift = beta - run_mean * scale
        apply_tanh = i < num_convs - 1
        params.append((w, scale.reshape(1, cout), shift.reshape(1, cout),
                       apply_tanh))
    return params


def pack_postnet_params(params, lanes=LANES):
    """Zero-pads channels to `lanes`, reshapes weights for im2col, stacks layers."""
    w_list, ss_list = [], []
    for (w, scale, shift, _apply_tanh) in params:
        K, cin, cout = w.shape
        wp = jnp.zeros((K, lanes, lanes), jnp.float32)
        wp = wp.at[:, :cin, :cout].set(w)
        w_list.append(wp.reshape(K * lanes, lanes))
        sc = jnp.zeros((lanes,), jnp.float32).at[:cout].set(scale.reshape(-1))
        sh = jnp.zeros((lanes,), jnp.float32).at[:cout].set(shift.reshape(-1))
        ss_list.append(jnp.stack([sc, sh], axis=0))
    return jnp.stack(w_list, axis=0), jnp.stack(ss_list, axis=0)


# Pure-JAX reference for correctness checking (uses the unpadded params).
def postnet_reference(x, params):
    for (w, scale, shift, apply_tanh) in params:
        K = w.shape[0]
        pad = (K - 1) // 2
        y = lax.conv_general_dilated(
            x, w, window_strides=(1,), padding=[(pad, pad)],
            dimension_numbers=("NWC", "WIO", "NWC"))
        y = y * scale[0] + shift[0]
        if apply_tanh:
            y = jnp.tanh(y)
        x = y
    return x


if __name__ == "__main__":
    # Synthetic hparams (small but structurally faithful).
    mel_dim = 16
    postnet_conv_channels = 32
    postnet_num_convs = 5
    postnet_conv_kernel_size = 5

    B, T = 2, 16

    key = jax.random.PRNGKey(0)
    key, k_x = jax.random.split(key)
    x = jax.random.normal(k_x, (B, T, mel_dim), jnp.float32)

    params = make_postnet_params(key, mel_dim, postnet_conv_channels,
                                 postnet_num_convs, postnet_conv_kernel_size)
    w_all, ss_all = pack_postnet_params(params)

    out = postnet_forward(x, w_all, ss_all, mel_dim)
    out = jax.block_until_ready(out)

    ref = postnet_reference(x, params)
    assert out.shape == (B, T, mel_dim)
    assert jnp.allclose(out, ref, atol=2e-4, rtol=2e-4), "mismatch vs reference"

    print("KERNEL_OK")
</pallas_src>

<mosaic_0001>
module attributes {stable_mosaic.version = 11 : i64} {
  func.func @postnet_fused_kernel(%arg0: i32, %arg1: memref<1x16x128xf32, #tpu.memory_space<vmem>>, %arg2: memref<5x640x128xf32, #tpu.memory_space<vmem>>, %arg3: memref<5x2x128xf32, #tpu.memory_space<vmem>>, %arg4: memref<1x16x128xf32, #tpu.memory_space<vmem>>, %arg5: memref<32x128xf32, #tpu.memory_space<vmem>>, %arg6: memref<32x128xf32, #tpu.memory_space<vmem>>) attributes {dimension_semantics = [#tpu.dimension_semantics<parallel>], iteration_bounds = array<i64: 2>, scalar_prefetch = 0 : i64, scratch_operands = 2 : i64, tpu.core_type = #tpu.core_type<tc>, window_params = [{transform_indices = @transform_0, window_bounds = array<i64: 1, 16, 128>}, {pipeline_mode = #tpu.pipeline_mode<synchronous>, transform_indices = @transform_1, window_bounds = array<i64: 5, 640, 128>}, {pipeline_mode = #tpu.pipeline_mode<synchronous>, transform_indices = @transform_2, window_bounds = array<i64: 5, 2, 128>}, {transform_indices = @transform_3, window_bounds = array<i64: 1, 16, 128>}]} {
    %cst = arith.constant 0.000000e+00 : f32
    %0 = vector.broadcast %cst : f32 to vector<32x128xf32>
    %c0 = arith.constant 0 : index
    %c0_0 = arith.constant 0 : index
    %1 = vector.load %arg5[%c0, %c0_0] : memref<32x128xf32, #tpu.memory_space<vmem>>, vector<32x128xf32>
    tpu.vector_store %arg5[%c0, %c0_0], %0 {strides = array<i32>} : memref<32x128xf32, #tpu.memory_space<vmem>>, vector<32x128xf32>,
    %cst_1 = arith.constant 0.000000e+00 : f32
    %2 = vector.broadcast %cst_1 : f32 to vector<32x128xf32>
    %c0_2 = arith.constant 0 : index
    %c0_3 = arith.constant 0 : index
    %3 = vector.load %arg6[%c0_2, %c0_3] : memref<32x128xf32, #tpu.memory_space<vmem>>, vector<32x128xf32>
    tpu.vector_store %arg6[%c0_2, %c0_3], %2 {strides = array<i32>} : memref<32x128xf32, #tpu.memory_space<vmem>>, vector<32x128xf32>,
    %c0_4 = arith.constant 0 : index
    %c0_5 = arith.constant 0 : index
    %c0_6 = arith.constant 0 : index
    %4 = vector.load %arg1[%c0_4, %c0_5, %c0_6] : memref<1x16x128xf32, #tpu.memory_space<vmem>>, vector<1x16x128xf32>
    %5 = vector.shape_cast %4 : vector<1x16x128xf32> to vector<16x128xf32>
    %c8 = arith.constant 8 : index
    %c0_7 = arith.constant 0 : index
    %6 = vector.load %arg5[%c8, %c0_7] : memref<32x128xf32, #tpu.memory_space<vmem>>, vector<16x128xf32>
    tpu.vector_store %arg5[%c8, %c0_7], %5 {strides = array<i32>} : memref<32x128xf32, #tpu.memory_space<vmem>>, vector<16x128xf32>,
    %c6 = arith.constant 6 : index
    %c0_8 = arith.constant 0 : index
    %7 = vector.load %arg5[%c6, %c0_8] : memref<32x128xf32, #tpu.memory_space<vmem>>, vector<16x128xf32>
    %c7 = arith.constant 7 : index
    %c0_9 = arith.constant 0 : index
    %8 = vector.load %arg5[%c7, %c0_9] : memref<32x128xf32, #tpu.memory_space<vmem>>, vector<16x128xf32>
    %c8_10 = arith.constant 8 : index
    %c0_11 = arith.constant 0 : index
    %9 = vector.load %arg5[%c8_10, %c0_11] : memref<32x128xf32, #tpu.memory_space<vmem>>, vector<16x128xf32>
    %c9 = arith.constant 9 : index
    %c0_12 = arith.constant 0 : index
    %10 = vector.load %arg5[%c9, %c0_12] : memref<32x128xf32, #tpu.memory_space<vmem>>, vector<16x128xf32>
    %c10 = arith.constant 10 : index
    %c0_13 = arith.constant 0 : index
    %11 = vector.load %arg5[%c10, %c0_13] : memref<32x128xf32, #tpu.memory_space<vmem>>, vector<16x128xf32>
    %12 = tpu.concatenate %7, %8, %9, %10, %11 in 1 : vector<16x128xf32>, vector<16x128xf32>, vector<16x128xf32>, vector<16x128xf32>, vector<16x128xf32> -> vector<16x640xf32>
    %c0_14 = arith.constant 0 : index
    %c0_15 = arith.constant 0 : index
    %c0_16 = arith.constant 0 : index
    %13 = vector.load %arg2[%c0_14, %c0_15, %c0_16] : memref<5x640x128xf32, #tpu.memory_space<vmem>>, vector<1x640x128xf32>
    %14 = vector.shape_cast %13 : vector<1x640x128xf32> to vector<640x128xf32>
    %cst_17 = arith.constant dense<0.000000e+00> : vector<16x128xf32>
    %15 = tpu.matmul %12, %14, %cst_17 {dimension_numbers = #tpu.dot_dimension_numbers<[1], [0], [0], [1], [0, 0, 1, 1], [], []>} : vector<16x640xf32>, vector<640x128xf32>, vector<16x128xf32> -> vector<16x128xf32>
    %c0_18 = arith.constant 0 : index
    %c0_19 = arith.constant 0 : index
    %c0_20 = arith.constant 0 : index
    %16 = vector.load %arg3[%c0_18, %c0_19, %c0_20] : memref<5x2x128xf32, #tpu.memory_space<vmem>>, vector<1x2x128xf32>
    %17 = vector.shape_cast %16 : vector<1x2x128xf32> to vector<2x128xf32>
    %18 = vector.extract_strided_slice %17 {offsets = [0, 0], sizes = [1, 128], strides = [1, 1]} : vector<2x128xf32> to vector<1x128xf32>
    %19 = vector.broadcast %18 : vector<1x128xf32> to vector<16x128xf32>
    %20 = arith.mulf %15, %19 : vector<16x128xf32>
    %21 = vector.extract_strided_slice %17 {offsets = [1, 0], sizes = [1, 128], strides = [1, 1]} : vector<2x128xf32> to vector<1x128xf32>
    %22 = vector.broadcast %21 : vector<1x128xf32> to vector<16x128xf32>
    %23 = arith.addf %20, %22 : vector<16x128xf32>
    %24 = math.tanh %23 : vector<16x128xf32>
    %c8_21 = arith.constant 8 : index
    %c0_22 = arith.constant 0 : index
    %25 = vector.load %arg6[%c8_21, %c0_22] : memref<32x128xf32, #tpu.memory_space<vmem>>, vector<16x128xf32>
    tpu.vector_store %arg6[%c8_21, %c0_22], %24 {strides = array<i32>} : memref<32x128xf32, #tpu.memory_space<vmem>>, vector<16x128xf32>,
    %c6_23 = arith.constant 6 : index
    %c0_24 = arith.constant 0 : index
    %26 = vector.load %arg6[%c6_23, %c0_24] : memref<32x128xf32, #tpu.memory_space<vmem>>, vector<16x128xf32>
    %c7_25 = arith.constant 7 : index
    %c0_26 = arith.constant 0 : index
    %27 = vector.load %arg6[%c7_25, %c0_26] : memref<32x128xf32, #tpu.memory_space<vmem>>, vector<16x128xf32>
    %c8_27 = arith.constant 8 : index
    %c0_28 = arith.constant 0 : index
    %28 = vector.load %arg6[%c8_27, %c0_28] : memref<32x128xf32, #tpu.memory_space<vmem>>, vector<16x128xf32>
    %c9_29 = arith.constant 9 : index
    %c0_30 = arith.constant 0 : index
    %29 = vector.load %arg6[%c9_29, %c0_30] : memref<32x128xf32, #tpu.memory_space<vmem>>, vector<16x128xf32>
    %c10_31 = arith.constant 10 : index
    %c0_32 = arith.constant 0 : index
    %30 = vector.load %arg6[%c10_31, %c0_32] : memref<32x128xf32, #tpu.memory_space<vmem>>, vector<16x128xf32>
    %31 = tpu.concatenate %26, %27, %28, %29, %30 in 1 : vector<16x128xf32>, vector<16x128xf32>, vector<16x128xf32>, vector<16x128xf32>, vector<16x128xf32> -> vector<16x640xf32>
    %c1 = arith.constant 1 : index
    %c0_33 = arith.constant 0 : index
    %c0_34 = arith.constant 0 : index
    %32 = vector.load %arg2[%c1, %c0_33, %c0_34] : memref<5x640x128xf32, #tpu.memory_space<vmem>>, vector<1x640x128xf32>
    %33 = vector.shape_cast %32 : vector<1x640x128xf32> to vector<640x128xf32>
    %cst_35 = arith.constant dense<0.000000e+00> : vector<16x128xf32>
    %34 = tpu.matmul %31, %33, %cst_35 {dimension_numbers = #tpu.dot_dimension_numbers<[1], [0], [0], [1], [0, 0, 1, 1], [], []>} : vector<16x640xf32>, vector<640x128xf32>, vector<16x128xf32> -> vector<16x128xf32>
    %c1_36 = arith.constant 1 : index
    %c0_37 = arith.constant 0 : index
    %c0_38 = arith.constant 0 : index
    %35 = vector.load %arg3[%c1_36, %c0_37, %c0_38] : memref<5x2x128xf32, #tpu.memory_space<vmem>>, vector<1x2x128xf32>
    %36 = vector.shape_cast %35 : vector<1x2x128xf32> to vector<2x128xf32>
    %37 = vector.extract_strided_slice %36 {offsets = [0, 0], sizes = [1, 128], strides = [1, 1]} : vector<2x128xf32> to vector<1x128xf32>
    %38 = vector.broadcast %37 : vector<1x128xf32> to vector<16x128xf32>
    %39 = arith.mulf %34, %38 : vector<16x128xf32>
    %40 = vector.extract_strided_slice %36 {offsets = [1, 0], sizes = [1, 128], strides = [1, 1]} : vector<2x128xf32> to vector<1x128xf32>
    %41 = vector.broadcast %40 : vector<1x128xf32> to vector<16x128xf32>
    %42 = arith.addf %39, %41 : vector<16x128xf32>
    %43 = math.tanh %42 : vector<16x128xf32>
    %c8_39 = arith.constant 8 : index
    %c0_40 = arith.constant 0 : index
    %44 = vector.load %arg5[%c8_39, %c0_40] : memref<32x128xf32, #tpu.memory_space<vmem>>, vector<16x128xf32>
    tpu.vector_store %arg5[%c8_39, %c0_40], %43 {strides = array<i32>} : memref<32x128xf32, #tpu.memory_space<vmem>>, vector<16x128xf32>,
    %c6_41 = arith.constant 6 : index
    %c0_42 = arith.constant 0 : index
    %45 = vector.load %arg5[%c6_41, %c0_42] : memref<32x128xf32, #tpu.memory_space<vmem>>, vector<16x128xf32>
    %c7_43 = arith.constant 7 : index
    %c0_44 = arith.constant 0 : index
    %46 = vector.load %arg5[%c7_43, %c0_44] : memref<32x128xf32, #tpu.memory_space<vmem>>, vector<16x128xf32>
    %c8_45 = arith.constant 8 : index
    %c0_46 = arith.constant 0 : index
    %47 = vector.load %arg5[%c8_45, %c0_46] : memref<32x128xf32, #tpu.memory_space<vmem>>, vector<16x128xf32>
    %c9_47 = arith.constant 9 : index
    %c0_48 = arith.constant 0 : index
    %48 = vector.load %arg5[%c9_47, %c0_48] : memref<32x128xf32, #tpu.memory_space<vmem>>, vector<16x128xf32>
    %c10_49 = arith.constant 10 : index
    %c0_50 = arith.constant 0 : index
    %49 = vector.load %arg5[%c10_49, %c0_50] : memref<32x128xf32, #tpu.memory_space<vmem>>, vector<16x128xf32>
    %50 = tpu.concatenate %45, %46, %47, %48, %49 in 1 : vector<16x128xf32>, vector<16x128xf32>, vector<16x128xf32>, vector<16x128xf32>, vector<16x128xf32> -> vector<16x640xf32>
    %c2 = arith.constant 2 : index
    %c0_51 = arith.constant 0 : index
    %c0_52 = arith.constant 0 : index
    %51 = vector.load %arg2[%c2, %c0_51, %c0_52] : memref<5x640x128xf32, #tpu.memory_space<vmem>>, vector<1x640x128xf32>
    %52 = vector.shape_cast %51 : vector<1x640x128xf32> to vector<640x128xf32>
    %cst_53 = arith.constant dense<0.000000e+00> : vector<16x128xf32>
    %53 = tpu.matmul %50, %52, %cst_53 {dimension_numbers = #tpu.dot_dimension_numbers<[1], [0], [0], [1], [0, 0, 1, 1], [], []>} : vector<16x640xf32>, vector<640x128xf32>, vector<16x128xf32> -> vector<16x128xf32>
    %c2_54 = arith.constant 2 : index
    %c0_55 = arith.constant 0 : index
    %c0_56 = arith.constant 0 : index
    %54 = vector.load %arg3[%c2_54, %c0_55, %c0_56] : memref<5x2x128xf32, #tpu.memory_space<vmem>>, vector<1x2x128xf32>
    %55 = vector.shape_cast %54 : vector<1x2x128xf32> to vector<2x128xf32>
    %56 = vector.extract_strided_slice %55 {offsets = [0, 0], sizes = [1, 128], strides = [1, 1]} : vector<2x128xf32> to vector<1x128xf32>
    %57 = vector.broadcast %56 : vector<1x128xf32> to vector<16x128xf32>
    %58 = arith.mulf %53, %57 : vector<16x128xf32>
    %59 = vector.extract_strided_slice %55 {offsets = [1, 0], sizes = [1, 128], strides = [1, 1]} : vector<2x128xf32> to vector<1x128xf32>
    %60 = vector.broadcast %59 : vector<1x128xf32> to vector<16x128xf32>
    %61 = arith.addf %58, %60 : vector<16x128xf32>
    %62 = math.tanh %61 : vector<16x128xf32>
    %c8_57 = arith.constant 8 : index
    %c0_58 = arith.constant 0 : index
    %63 = vector.load %arg6[%c8_57, %c0_58] : memref<32x128xf32, #tpu.memory_space<vmem>>, vector<16x128xf32>
    tpu.vector_store %arg6[%c8_57, %c0_58], %62 {strides = array<i32>} : memref<32x128xf32, #tpu.memory_space<vmem>>, vector<16x128xf32>,
    %c6_59 = arith.constant 6 : index
    %c0_60 = arith.constant 0 : index
    %64 = vector.load %arg6[%c6_59, %c0_60] : memref<32x128xf32, #tpu.memory_space<vmem>>, vector<16x128xf32>
    %c7_61 = arith.constant 7 : index
    %c0_62 = arith.constant 0 : index
    %65 = vector.load %arg6[%c7_61, %c0_62] : memref<32x128xf32, #tpu.memory_space<vmem>>, vector<16x128xf32>
    %c8_63 = arith.constant 8 : index
    %c0_64 = arith.constant 0 : index
    %66 = vector.load %arg6[%c8_63, %c0_64] : memref<32x128xf32, #tpu.memory_space<vmem>>, vector<16x128xf32>
    %c9_65 = arith.constant 9 : index
    %c0_66 = arith.constant 0 : index
    %67 = vector.load %arg6[%c9_65, %c0_66] : memref<32x128xf32, #tpu.memory_space<vmem>>, vector<16x128xf32>
    %c10_67 = arith.constant 10 : index
    %c0_68 = arith.constant 0 : index
    %68 = vector.load %arg6[%c10_67, %c0_68] : memref<32x128xf32, #tpu.memory_space<vmem>>, vector<16x128xf32>
    %69 = tpu.concatenate %64, %65, %66, %67, %68 in 1 : vector<16x128xf32>, vector<16x128xf32>, vector<16x128xf32>, vector<16x128xf32>, vector<16x128xf32> -> vector<16x640xf32>
    %c3 = arith.constant 3 : index
    %c0_69 = arith.constant 0 : index
    %c0_70 = arith.constant 0 : index
    %70 = vector.load %arg2[%c3, %c0_69, %c0_70] : memref<5x640x128xf32, #tpu.memory_space<vmem>>, vector<1x640x128xf32>
    %71 = vector.shape_cast %70 : vector<1x640x128xf32> to vector<640x128xf32>
    %cst_71 = arith.constant dense<0.000000e+00> : vector<16x128xf32>
    %72 = tpu.matmul %69, %71, %cst_71 {dimension_numbers = #tpu.dot_dimension_numbers<[1], [0], [0], [1], [0, 0, 1, 1], [], []>} : vector<16x640xf32>, vector<640x128xf32>, vector<16x128xf32> -> vector<16x128xf32>
    %c3_72 = arith.constant 3 : index
    %c0_73 = arith.constant 0 : index
    %c0_74 = arith.constant 0 : index
    %73 = vector.load %arg3[%c3_72, %c0_73, %c0_74] : memref<5x2x128xf32, #tpu.memory_space<vmem>>, vector<1x2x128xf32>
    %74 = vector.shape_cast %73 : vector<1x2x128xf32> to vector<2x128xf32>
    %75 = vector.extract_strided_slice %74 {offsets = [0, 0], sizes = [1, 128], strides = [1, 1]} : vector<2x128xf32> to vector<1x128xf32>
    %76 = vector.broadcast %75 : vector<1x128xf32> to vector<16x128xf32>
    %77 = arith.mulf %72, %76 : vector<16x128xf32>
    %78 = vector.extract_strided_slice %74 {offsets = [1, 0], sizes = [1, 128], strides = [1, 1]} : vector<2x128xf32> to vector<1x128xf32>
    %79 = vector.broadcast %78 : vector<1x128xf32> to vector<16x128xf32>
    %80 = arith.addf %77, %79 : vector<16x128xf32>
    %81 = math.tanh %80 : vector<16x128xf32>
    %c8_75 = arith.constant 8 : index
    %c0_76 = arith.constant 0 : index
    %82 = vector.load %arg5[%c8_75, %c0_76] : memref<32x128xf32, #tpu.memory_space<vmem>>, vector<16x128xf32>
    tpu.vector_store %arg5[%c8_75, %c0_76], %81 {strides = array<i32>} : memref<32x128xf32, #tpu.memory_space<vmem>>, vector<16x128xf32>,
    %c6_77 = arith.constant 6 : index
    %c0_78 = arith.constant 0 : index
    %83 = vector.load %arg5[%c6_77, %c0_78] : memref<32x128xf32, #tpu.memory_space<vmem>>, vector<16x128xf32>
    %c7_79 = arith.constant 7 : index
    %c0_80 = arith.constant 0 : index
    %84 = vector.load %arg5[%c7_79, %c0_80] : memref<32x128xf32, #tpu.memory_space<vmem>>, vector<16x128xf32>
    %c8_81 = arith.constant 8 : index
    %c0_82 = arith.constant 0 : index
    %85 = vector.load %arg5[%c8_81, %c0_82] : memref<32x128xf32, #tpu.memory_space<vmem>>, vector<16x128xf32>
    %c9_83 = arith.constant 9 : index
    %c0_84 = arith.constant 0 : index
    %86 = vector.load %arg5[%c9_83, %c0_84] : memref<32x128xf32, #tpu.memory_space<vmem>>, vector<16x128xf32>
    %c10_85 = arith.constant 10 : index
    %c0_86 = arith.constant 0 : index
    %87 = vector.load %arg5[%c10_85, %c0_86] : memref<32x128xf32, #tpu.memory_space<vmem>>, vector<16x128xf32>
    %88 = tpu.concatenate %83, %84, %85, %86, %87 in 1 : vector<16x128xf32>, vector<16x128xf32>, vector<16x128xf32>, vector<16x128xf32>, vector<16x128xf32> -> vector<16x640xf32>
    %c4 = arith.constant 4 : index
    %c0_87 = arith.constant 0 : index
    %c0_88 = arith.constant 0 : index
    %89 = vector.load %arg2[%c4, %c0_87, %c0_88] : memref<5x640x128xf32, #tpu.memory_space<vmem>>, vector<1x640x128xf32>
    %90 = vector.shape_cast %89 : vector<1x640x128xf32> to vector<640x128xf32>
    %cst_89 = arith.constant dense<0.000000e+00> : vector<16x128xf32>
    %91 = tpu.matmul %88, %90, %cst_89 {dimension_numbers = #tpu.dot_dimension_numbers<[1], [0], [0], [1], [0, 0, 1, 1], [], []>} : vector<16x640xf32>, vector<640x128xf32>, vector<16x128xf32> -> vector<16x128xf32>
    %c4_90 = arith.constant 4 : index
    %c0_91 = arith.constant 0 : index
    %c0_92 = arith.constant 0 : index
    %92 = vector.load %arg3[%c4_90, %c0_91, %c0_92] : memref<5x2x128xf32, #tpu.memory_space<vmem>>, vector<1x2x128xf32>
    %93 = vector.shape_cast %92 : vector<1x2x128xf32> to vector<2x128xf32>
    %94 = vector.extract_strided_slice %93 {offsets = [0, 0], sizes = [1, 128], strides = [1, 1]} : vector<2x128xf32> to vector<1x128xf32>
    %95 = vector.broadcast %94 : vector<1x128xf32> to vector<16x128xf32>
    %96 = arith.mulf %91, %95 : vector<16x128xf32>
    %97 = vector.extract_strided_slice %93 {offsets = [1, 0], sizes = [1, 128], strides = [1, 1]} : vector<2x128xf32> to vector<1x128xf32>
    %98 = vector.broadcast %97 : vector<1x128xf32> to vector<16x128xf32>
    %99 = arith.addf %96, %98 : vector<16x128xf32>
    %c0_93 = arith.constant 0 : index
    %c0_94 = arith.constant 0 : index
    %c0_95 = arith.constant 0 : index
    %100 = vector.load %arg4[%c0_93, %c0_94, %c0_95] : memref<1x16x128xf32, #tpu.memory_space<vmem>>, vector<1x16x128xf32>
    %101 = vector.shape_cast %100 : vector<1x16x128xf32> to vector<16x128xf32>
    %102 = vector.shape_cast %99 : vector<16x128xf32> to vector<1x16x128xf32>
    tpu.vector_store %arg4[%c0_93, %c0_94, %c0_95], %102 {strides = array<i32>} : memref<1x16x128xf32, #tpu.memory_space<vmem>>, vector<1x16x128xf32>,
    return
  }
  func.func @transform_0(%arg0: i32) -> (i32, i32, i32) {
    %c0_i32 = arith.constant 0 : i32
    %c0_i32_0 = arith.constant 0 : i32
    %c0_i32_1 = arith.constant 0 : i32
    return %arg0, %c0_i32, %c0_i32_0 : i32, i32, i32
  }
  func.func @transform_1(%arg0: i32) -> (i32, i32, i32) {
    %c0_i32 = arith.constant 0 : i32
    %c0_i32_0 = arith.constant 0 : i32
    %c0_i32_1 = arith.constant 0 : i32
    %c0_i32_2 = arith.constant 0 : i32
    return %c0_i32, %c0_i32_0, %c0_i32_1 : i32, i32, i32
  }
  func.func @transform_2(%arg0: i32) -> (i32, i32, i32) {
    %c0_i32 = arith.constant 0 : i32
    %c0_i32_0 = arith.constant 0 : i32
    %c0_i32_1 = arith.constant 0 : i32
    %c0_i32_2 = arith.constant 0 : i32
    return %c0_i32, %c0_i32_0, %c0_i32_1 : i32, i32, i32
  }
  func.func @transform_3(%arg0: i32) -> (i32, i32, i32) {
    %c0_i32 = arith.constant 0 : i32
    %c0_i32_0 = arith.constant 0 : i32
    %c0_i32_1 = arith.constant 0 : i32
    return %arg0, %c0_i32, %c0_i32_0 : i32, i32, i32
  }
}

</mosaic_0001>

<bundles_post_ra>
// kernel: tpu_custom_call.1
= control target key start
LH: loop header
LB: loop body
LE: loop exit
PB: predicated region body
PF: predicated region fallthrough
CT: control target
= control target key end

     0   :  { %8 = vsyncpa [#allocation5], 0  ;;  %s3688_s0 = inlined_call_operand.hbm [shape: f32[2,16,128], index: 0, kind: input, shape index: {}]   ;;  %s3689_s1 = inlined_call_operand.hbm [shape: f32[5,640,128], index: 1, kind: input, shape index: {}]   ;;  %s3690_s2 = inlined_call_operand.hbm [shape: f32[5,2,128], index: 2, kind: input, shape index: {}]   ;;  %s3691_s3 = inlined_call_operand.hbm [shape: f32[2,16,128], index: 3, kind: output, shape index: {}]  }
   0x1   :  { %10 = vsyncpa [#allocation5 + $0x1], 0 }
   0x2   :  { %11 = vsyncpa [#allocation8], 0 }
   0x3   :  { %12 = vsyncpa [#allocation6], 0 }
   0x4   :  { %14 = vsyncpa [#allocation6 + $0x1], 0  ;;  %s3426_s12 = smov 0   ;;  %s3428_s13 = smov 0  }
   0x5   :  { %s3430_s14 = smov 0   ;;  %s3432_s15 = smov 0  }
   0x6 LB: > { %s3447_s16 = sadd.s32 4294967295, %s3393_s15   ;;  %s2002_s17 = sadd.s32 4294967294, %s3393_s15   ;;  %s3393_s15 = sphi %s3432_s15, %s3711_s15   ;;  %s3389_s14 = sphi %s3430_s14, %s3710_s14   ;;  %s3385_s13 = sphi %s3428_s13, %s3709_s13   ;;  %s3381_s12 = sphi %s3426_s12, %s3708_s12  }
   0x7   : > { %p40_p0 = scmp.ne.s32.totalorder %s3385_s13, %s3381_s12  ;;  %p3692_p1 = scmp.eq.s32.totalorder %s3447_s16, 0 }
   0x8   : > { %p112_p3 = scmp.eq.s32.totalorder %s2002_s17, 1  ;;  %p2003_p5 = scmp.ge.s32.totalorder %s3393_s15, 1 }
   0x9   : > { %p3456_p4 = por %p3692_p1, %p40_p0  ;;  %p119_p7 = scmp.lt.s32.totalorder %s3393_s15, 3 }
   0xa   : > { %p3461_p6 = por %p112_p3, %p40_p0  ;;  %s3395_s21 = smov [#allocation7]  }
   0xb   : > { %s3695_s18 = scalar_select %p3456_p4, 1, 0 }
   0xc   : > { %s3696_s19 = scalar_select %p3461_p6, 1, 0 }
   0xd   : > { %p3466_p8 = pnand %p2003_p5, %p119_p7  ;;  %s131_s22 = sshll.u32 %s3395_s21, 4  ;;  %s3470_s22 = int_to_ptr.vmem [resolvable:$true] %s131_s22 }
   0xe   : > { %s3396_s24 = smov [#allocation9]   ;;  %s3237_s28 = scalar_lea.hbm %s3689_s1, 51200 }
   0xf   : > { %p3159_p9 = pneg %p3466_p8  ;;  %s144_s25 = sshll.u32 %s3396_s24, 4  ;;  %s3481_s25 = int_to_ptr.vmem [resolvable:$true] %s144_s25 }
  0x10   : > { %p3238_p12 = scmp.ne.s32.totalorder %s3689_s1, %s3237_s28  ;;  %p3244_p5 = scmp.lt.u32.totalorder %s3237_s28, %s3689_s1 }
  0x11   : > { %p3477_p11 = pnand %p3159_p9, %p3692_p1 }
  0x13   : > { %p3239_p13 = pneg %p3477_p11 }
  0x15   : > { %p3240_p0 = pnand %p3239_p13, %p3238_p12 }
  0x17   : > { %p3241_p3 = pneg %p3240_p0 }
  0x19   : > { %p3246_p7 = pnand %p3244_p5, %p3241_p3 }
  0x1b   : > { %3249 = shalt.err (!%p3246_p7)
}
  0x1c   : > { %s3250_s6 = scalar_lea.vmem %s3470_s22, 51200  ;;  %p3258_p2 = scmp.lt.s32.totalorder %s3470_s22, %s3470_s22 }
  0x1d   : > { %p3251_p9 = scmp.ne.s32.totalorder %s3470_s22, %s3250_s6  ;;  %p3259_p12 = scmp.lt.s32.totalorder %s3250_s6, %s3250_s6 }
  0x1f   : > { %p3253_p10 = pnand %p3251_p9, %p3239_p13  ;;  %p3260_p0 = por %p3259_p12, %p3258_p2 }
  0x21   : > { %p3254_p1 = pneg %p3253_p10 }
  0x23   : > { %p3261_p6 = pnand %p3260_p0, %p3254_p1 }
  0x25   : > { %3264 = shalt.err (!%p3261_p6)
}
  0x26   : > { %s3397_s7 = smov 128   ;;  %s3398_s8 = smov 8  }
  0x27   : > { %3162 = dma.hbm_to_vmem [thread:$0]  (!%p3477_p11), %s3689_s1, 51200, %s3470_s22, [#allocation8], %s3397_s7, %s3397_s7, %s3398_s8  }
  0x28   : > { %s3265_s21 = scalar_lea.hbm %s3690_s2, 160 }
  0x29   : > { %p3266_p1 = scmp.ne.s32.totalorder %s3690_s2, %s3265_s21  ;;  %p3272_p10 = scmp.lt.u32.totalorder %s3265_s21, %s3690_s2 }
  0x2b   : > { %p3268_p2 = pnand %p3266_p1, %p3239_p13 }
  0x2d   : > { %p3269_p6 = pneg %p3268_p2 }
  0x2f   : > { %p3274_p3 = pnand %p3272_p10, %p3269_p6 }
  0x31   : > { %3277 = shalt.err (!%p3274_p3)
}
  0x32   : > { %s3278_s22 = scalar_lea.vmem %s3481_s25, 160  ;;  %p3286_p12 = scmp.lt.s32.totalorder %s3481_s25, %s3481_s25 }
  0x33   : > { %p3279_p5 = scmp.ne.s32.totalorder %s3481_s25, %s3278_s22  ;;  %p3287_p0 = scmp.lt.s32.totalorder %s3278_s22, %s3278_s22 }
  0x35   : > { %p3281_p7 = pnand %p3279_p5, %p3239_p13  ;;  %p3288_p1 = por %p3287_p0, %p3286_p12 }
  0x37   : > { %p3282_p9 = pneg %p3281_p7 }
  0x39   : > { %p3289_p2 = pnand %p3288_p1, %p3282_p9 }
  0x3b   : > { %3292 = shalt.err (!%p3289_p2)
}
  0x3c   : > { %s3399_s29 = smov 32   ;;  %s3400_s30 = smov 2  }
  0x3d   : > { %3165 = dma.hbm_to_vmem [thread:$0]  (!%p3477_p11), %s3690_s2, 160, %s3481_s25, [#allocation8], %s3399_s29, %s3399_s29, %s3400_s30  }
  0x3e   : > { %s3539_s6 = sadd.s32 1, %s3393_s15   ;;  %s27_s10 = sadd.s32 1, %s3389_s14 }
  0x3f   : > { %s24_s9 = ssub.s32 %s3393_s15, %s3539_s6  ;;  %p34_p6 = scmp.ne.s32.totalorder %s3389_s14, %s3385_s13 }
  0x40   : > { %p25_p13 = scmp.eq.s32.totalorder %s24_s9, 0  ;;  %p35_p10 = scmp.eq.s32.totalorder %s3393_s15, 0 }
  0x41   : > { %p3699_p5 = scmp.eq.s32.totalorder %s3447_s16, 1  ;;  %p3176_p9 = scmp.lt.s32.totalorder %s3393_s15, 2 }
  0x42   : > { %s3548_s11 = scalar_select %p25_p13, %s3389_s14, %s27_s10  }
  0x43   : > { %p36_p3 = por %p35_p10, %p34_p6  ;;  %p3552_p7 = por %p3699_p5, %p34_p6 }
  0x44   : > { %s158_s23 = sand.u32 1, %s3389_s14   ;;  %s2020_s25 = sshll.u32 %s3393_s15, 8 }
  0x45   : > { %s3700_s17 = scalar_select %p3552_p7, 1, 0 }
  0x46   : > { %s2007_s21 = sshll.u32 %s158_s23, 4  ;;  %s3562_s27 = scalar_lea.hbm %s3688_s0, %s2020_s25 }
  0x47   : > { %s162_s28 = scalar_lea.vmem [#allocation4], %s2007_s21  ;;  %p3566_p11 = pnand %p3176_p9, %p36_p3 }
  0x48   : > { %s169_s22 = sshll.u32 %s162_s28, 4  ;;  %s3570_s30 = scalar_lea.sflag [#allocation5], %s158_s23  ;;  %s3564_s22 = int_to_ptr.vmem [resolvable:$true] %s169_s22 }
  0x49   : > { %s3293_s4 = scalar_lea.hbm %s3562_s27, 256  ;;  %p3295_p0 = pneg %p3566_p11 }
  0x4a   : > { %p3294_p12 = scmp.ne.s32.totalorder %s3562_s27, %s3293_s4  ;;  %s3298_s10 = scalar_lea.hbm %s3688_s0, 512 }
  0x4b   : > { %p3299_p13 = scmp.lt.u32.totalorder %s3562_s27, %s3688_s0  ;;  %p3300_p6 = scmp.lt.u32.totalorder %s3298_s10, %s3293_s4 }
  0x4c   : > { %p3296_p1 = pnand %p3295_p0, %p3294_p12  ;;  %p3302_p3 = scmp.lt.u32.totalorder %s3293_s4, %s3562_s27 }
  0x4d   : > { %p3301_p10 = por %p3300_p6, %p3299_p13 }
  0x4e   : > { %p3297_p2 = pneg %p3296_p1 }
  0x4f   : > { %p3303_p5 = por %p3302_p3, %p3301_p10 }
  0x51   : > { %p3304_p9 = pnand %p3303_p5, %p3297_p2 }
  0x53   : > { %3307 = shalt.err (!%p3304_p9)
}
  0x54   : > { %s3308_s23 = scalar_lea.vmem %s3564_s22, 256  ;;  %s3401_s24 = smov [#allocation4]  }
  0x55   : > { %p3309_p12 = scmp.ne.s32.totalorder %s3564_s22, %s3308_s23  ;;  %s3313_s26 = sshll.u32 %s3401_s24, 4  ;;  %s3314_s26 = int_to_ptr.vmem [resolvable:$false] %s3313_s26 }
  0x56   : > { %s3315_s28 = scalar_lea.vmem %s3314_s26, 512  ;;  %p3316_p4 = scmp.lt.s32.totalorder %s3564_s22, %s3314_s26 }
  0x57   : > { %p3311_p1 = pnand %p3309_p12, %p3295_p0  ;;  %p3317_p13 = scmp.lt.s32.totalorder %s3315_s28, %s3308_s23 }
  0x59   : > { %p3312_p7 = pneg %p3311_p1  ;;  %p3318_p6 = por %p3317_p13, %p3316_p4 }
  0x5b   : > { %p3319_p10 = pnand %p3318_p6, %p3312_p7 }
  0x5d   : > { %3322 = shalt.err (!%p3319_p10)
}
  0x5e   : > { %3169 = dma.hbm_to_vmem [thread:$0]  (!%p3566_p11), %s3562_s27, 256, %s3564_s22, %s3570_s30, %s3397_s7, %s3397_s7, %s3398_s8  }
  0x5f   : > { %181 = sbr.rel (%p3466_p8) target bundleno = 1496 (0x5d8), region = 32  ;;  %s3604_s4 = sand.u32 (!%p3466_p8), 1, %s3385_s13  }
  0x60   : > { %s2011_s5 = sshll.u32 (!%p3466_p8), %s3604_s4, 4  ;;  %s184_s9 = scalar_lea.sflag (!%p3466_p8), [#allocation5], %s3604_s4 }
  0x61   : > { %s3610_s29 = scalar_lea.vmem (!%p3466_p8), [#allocation4], %s2011_s5  ;;  %p3702_p4 = scmp.ne.s32.totalorder (!%p3466_p8), %s3695_s18, 0 }
  0x66   : > { %3368 = dma.done.wait (%p3702_p4), %s184_s9, 256  }
  0x67   : > { %3370 = vsyncadd (%p3702_p4), %s184_s9, 4294967040  ;;  %p3703_p7 = scmp.eq.s32.totalorder %s3447_s16, 0 }
  0x69   : > { %3372 = dma.done.wait (%p3703_p7), [#allocation8], 51360   ;;  %p3704_p8 = pmov %p3703_p7 }
  0x6a   : > { %v3402_v0 = vmov 0.0   ;;  %v256_v1 = vld [vmem:[#allocation7 + $0x80] sm:$0xff]  ;;  %v257_v2 = vld [vmem:[#allocation7 + $0x88] sm:$0xff]  ;;  %v258_v12 = vld [vmem:[#allocation7 + $0x90] sm:$0xff]  ;;  %s217_s18 = scalar_lea.vmem [#allocation10], %s2011_s5  ;;  %s2021_s7 = sshll.u32 %s3447_s16, 8 }
  0x6b   : > { %3374 = vsyncadd (%p3704_p8), [#allocation8], 4294915936  ;;  %218 = vst [vmem:[#allocation2] sm:$0xff] %v3402_v0  ;;  %v288_v3 = vld [vmem:[#allocation7 + $0x180] sm:$0xff]  ;;  %v2667_v4 = vpack.c.bf16 %v257_v2, %v256_v1  ;;  %v289_v5 = vld [vmem:[#allocation7 + $0x188] sm:$0xff]  ;;  %s1910_s20 = sshll.u32 %s217_s18, 4  ;;  %s3644_s22 = scalar_lea.hbm %s3691_s3, %s2021_s7  ;;  %s3639_s20 = int_to_ptr.vmem [resolvable:$true] %s1910_s20 }
  0x6c   : > { %221 = vst [vmem:[#allocation2 + $0x18] sm:$0xff] %v3402_v0  ;;  %222 = vst [vmem:[#allocation3] sm:$0xff] %v3402_v0  ;;  %v240_v6 = vld [vmem:[#allocation7] sm:$0xff]  ;;  %v241_v7 = vld [vmem:[#allocation7 + $0x8] sm:$0xff]  ;;  %v2699_v8 = vpack.c.bf16 %v289_v5, %v288_v3  ;;  %s1897_s30 = scalar_lea.sflag [#allocation6], %s3604_s4  ;;  %s3323_s10 = scalar_lea.vmem %s3639_s20, 256 }
  0x6d   : > { %225 = vst [vmem:[#allocation3 + $0x18] sm:$0xff] %v3402_v0  ;;  %v2669_v9 = vpack.c.bf16 %v241_v7, %v240_v6  ;;  %v272_v10 = vld [vmem:[#allocation7 + $0x100] sm:$0xff]  ;;  %v273_v11 = vld [vmem:[#allocation7 + $0x108] sm:$0xff]  ;;  %2668 = vmatprep.subr.bf16.mxu0 %v2667_v4  ;;  %v259_v14 = vld [vmem:[#allocation7 + $0x98] sm:$0xff]  ;;  %p3324_p11 = scmp.ne.s32.totalorder %s3639_s20, %s3323_s10  ;;  %p3705_p0 = scmp.ne.s32.totalorder %s3700_s17, 0 }
  0x6e   : > { %v2701_v13 = vpack.c.bf16 %v273_v11, %v272_v10  ;;  %v290_v15 = vld [vmem:[#allocation7 + $0x190] sm:$0xff]  ;;  %v291_v16 = vld [vmem:[#allocation7 + $0x198] sm:$0xff]  ;;  %2700 = vmatprep.subr.bf16.mxu1 %v2699_v8  ;;  %v2671_v17 = vpack.c.bf16 %v259_v14, %v258_v12  ;;  %v260_v24 = vld [vmem:[#allocation7 + $0xa0] sm:$0xff]  ;;  %s3403_s16 = smov [#allocation10]  }
  0x6f   : > { %2670 = vmatpush3.bf16.msra.mxu0 %v2669_v9  ;;  %v2703_v18 = vpack.c.bf16 %v291_v16, %v290_v15  ;;  %v242_v19 = vld [vmem:[#allocation7 + $0x10] sm:$0xff]  ;;  %v243_v20 = vld [vmem:[#allocation7 + $0x18] sm:$0xff]  ;;  %v261_v25 = vld [vmem:[#allocation7 + $0xa8] sm:$0xff]  ;;  %p3325_p2 = pnand %p3324_p11, %p3705_p0  ;;  %s3327_s21 = sshll.u32 %s3403_s16, 4  ;;  %s3328_s21 = int_to_ptr.vmem [resolvable:$false] %s3327_s21 }
  0x70   : > { %v274_v21 = vld [vmem:[#allocation7 + $0x110] sm:$0xff]  ;;  %2702 = vmatpush3.bf16.msra.mxu1 %v2701_v13  ;;  %v2673_v22 = vpack.c.bf16 %v243_v20, %v242_v19  ;;  %v275_v23 = vld [vmem:[#allocation7 + $0x118] sm:$0xff]  ;;  %2672 = vmatprep.subr.bf16.mxu0 %v2671_v17  ;;  %v2675_v27 = vpack.c.bf16 %v261_v25, %v260_v24  ;;  %v292_v28 = vld [vmem:[#allocation7 + $0x1a0] sm:$0xff]  ;;  %s3329_s25 = scalar_lea.vmem %s3328_s21, 512  ;;  %p3330_p5 = scmp.lt.s32.totalorder %s3639_s20, %s3328_s21 }
  0x71   : > { %2704 = vmatprep.subr.bf16.mxu1 %v2703_v18  ;;  %v2705_v26 = vpack.c.bf16 %v275_v23, %v274_v21  ;;  %v293_v29 = vld [vmem:[#allocation7 + $0x1a8] sm:$0xff]  ;;  %v244_v30 = vld [vmem:[#allocation7 + $0x20] sm:$0xff]  ;;  %v262_v36 = vld [vmem:[#allocation7 + $0xb0] sm:$0xff]  ;;  %p3326_p3 = pneg %p3325_p2  ;;  %p3331_p9 = scmp.lt.s32.totalorder %s3329_s25, %s3323_s10 }
  0x72   : > { %v2707_v31 = vpack.c.bf16 %v293_v29, %v292_v28  ;;  %v245_v32 = vld [vmem:[#allocation7 + $0x28] sm:$0xff]  ;;  %v276_v33 = vld [vmem:[#allocation7 + $0x120] sm:$0xff]  ;;  %v263_v37 = vld [vmem:[#allocation7 + $0xb8] sm:$0xff] }
  0x73   : > { %v277_v34 = vld [vmem:[#allocation7 + $0x128] sm:$0xff]  ;;  %2674 = vmatpush3.bf16.msra.mxu0 %v2673_v22  ;;  %v2677_v35 = vpack.c.bf16 %v245_v32, %v244_v30  ;;  %v294_v38 = vld [vmem:[#allocation7 + $0x1b0] sm:$0xff]  ;;  %v2679_v40 = vpack.c.bf16 %v263_v37, %v262_v36  ;;  %v295_v41 = vld [vmem:[#allocation7 + $0x1b8] sm:$0xff]  ;;  %p3332_p12 = por %p3331_p9, %p3330_p5 }
  0x74   : > { %2706 = vmatpush3.bf16.msra.mxu1 %v2705_v26  ;;  %2676 = vmatprep.subr.bf16.mxu0 %v2675_v27  ;;  %v2709_v39 = vpack.c.bf16 %v277_v34, %v276_v33  ;;  %v246_v42 = vld [vmem:[#allocation7 + $0x30] sm:$0xff]  ;;  %v247_v43 = vld [vmem:[#allocation7 + $0x38] sm:$0xff]  ;;  %v2711_v44 = vpack.c.bf16 %v295_v41, %v294_v38  ;;  %v264_v47 = vld [vmem:[#allocation7 + $0xc0] sm:$0xff] }
  0x75   : > { %2708 = vmatprep.subr.bf16.mxu1 %v2707_v31  ;;  %v278_v45 = vld [vmem:[#allocation7 + $0x130] sm:$0xff]  ;;  %v279_v46 = vld [vmem:[#allocation7 + $0x138] sm:$0xff]  ;;  %v265_v48 = vld [vmem:[#allocation7 + $0xc8] sm:$0xff]  ;;  %v2681_v51 = vpack.c.bf16 %v247_v43, %v246_v42  ;;  %p3333_p1 = pnand %p3332_p12, %p3326_p3 }
  0x76   : > { %v296_v49 = vld [vmem:[#allocation7 + $0x1c0] sm:$0xff]  ;;  %v297_v50 = vld [vmem:[#allocation7 + $0x1c8] sm:$0xff]  ;;  %v2713_v52 = vpack.c.bf16 %v279_v46, %v278_v45  ;;  %v2683_v53 = vpack.c.bf16 %v265_v48, %v264_v47  ;;  %v266_v59 = vld [vmem:[#allocation7 + $0xd0] sm:$0xff] }
  0x77   : > { %2678 = vmatpush3.bf16.msra.mxu0 %v2677_v35  ;;  %v248_v54 = vld [vmem:[#allocation7 + $0x40] sm:$0xff]  ;;  %v249_v55 = vld [vmem:[#allocation7 + $0x48] sm:$0xff]  ;;  %v2715_v57 = vpack.c.bf16 %v297_v50, %v296_v49  ;;  %v267_v60 = vld [vmem:[#allocation7 + $0xd8] sm:$0xff] }
  0x78   : > { %2710 = vmatpush3.bf16.msra.mxu1 %v2709_v39  ;;  %2680 = vmatprep.subr.bf16.mxu0 %v2679_v40  ;;  %v280_v56 = vld [vmem:[#allocation7 + $0x140] sm:$0xff]  ;;  %v281_v58 = vld [vmem:[#allocation7 + $0x148] sm:$0xff]  ;;  %v298_v61 = vld [vmem:[#allocation7 + $0x1d0] sm:$0xff]  ;;  %v2685_v63 = vpack.c.bf16 %v249_v55, %v248_v54  ;;  %v2687_v1 = vpack.c.bf16 %v267_v60, %v266_v59 }
  0x79   : > { %2712 = vmatprep.subr.bf16.mxu1 %v2711_v44  ;;  %v299_v62 = vld [vmem:[#allocation7 + $0x1d8] sm:$0xff]  ;;  %v2717_v0 = vpack.c.bf16 %v281_v58, %v280_v56  ;;  %v250_v2 = vld [vmem:[#allocation7 + $0x50] sm:$0xff]  ;;  %v268_v7 = vld [vmem:[#allocation7 + $0xe0] sm:$0xff] }
  0x7a   : > { %v251_v3 = vld [vmem:[#allocation7 + $0x58] sm:$0xff]  ;;  %v282_v4 = vld [vmem:[#allocation7 + $0x150] sm:$0xff]  ;;  %v2719_v5 = vpack.c.bf16 %v299_v62, %v298_v61  ;;  %v269_v8 = vld [vmem:[#allocation7 + $0xe8] sm:$0xff] }
  0x7b   : > { %2682 = vmatpush3.bf16.msra.mxu0 %v2681_v51  ;;  %v283_v6 = vld [vmem:[#allocation7 + $0x158] sm:$0xff]  ;;  %v300_v9 = vld [vmem:[#allocation7 + $0x1e0] sm:$0xff]  ;;  %v301_v10 = vld [vmem:[#allocation7 + $0x1e8] sm:$0xff]  ;;  %v2689_v11 = vpack.c.bf16 %v251_v3, %v250_v2  ;;  %v2691_v15 = vpack.c.bf16 %v269_v8, %v268_v7 }
  0x7c   : > { %2714 = vmatpush3.bf16.msra.mxu1 %v2713_v52  ;;  %2684 = vmatprep.subr.bf16.mxu0 %v2683_v53  ;;  %v252_v12 = vld [vmem:[#allocation7 + $0x60] sm:$0xff]  ;;  %v253_v13 = vld [vmem:[#allocation7 + $0x68] sm:$0xff]  ;;  %v2721_v14 = vpack.c.bf16 %v283_v6, %v282_v4  ;;  %v2723_v19 = vpack.c.bf16 %v301_v10, %v300_v9  ;;  %v270_v21 = vld [vmem:[#allocation7 + $0xf0] sm:$0xff] }
  0x7d   : > { %2716 = vmatprep.subr.bf16.mxu1 %v2715_v57  ;;  %v284_v16 = vld [vmem:[#allocation7 + $0x160] sm:$0xff]  ;;  %v227_v18 = vld [vmem:[%s3610_s29 + $0x8] sm:$0xff]  ;;  %v302_v23 = vld [vmem:[#allocation7 + $0x1f0] sm:$0xff]  ;;  %v2693_v25 = vpack.c.bf16 %v253_v13, %v252_v12 }
  0x7e   : > { %v226_v17 = vld [vmem:[%s3610_s29] sm:$0xff]  ;;  %v285_v20 = vld [vmem:[#allocation7 + $0x168] sm:$0xff]  ;;  %v271_v22 = vld [vmem:[#allocation7 + $0xf8] sm:$0xff]  ;;  %229 = vst [vmem:[#allocation2 + $0x10] sm:$0xff] %v227_v18 }
  0x7f   : > { %2686 = vmatpush3.bf16.msra.mxu0 %v2685_v63  ;;  %228 = vst [vmem:[#allocation2 + $0x8] sm:$0xff] %v226_v17  ;;  %v303_v24 = vld [vmem:[#allocation7 + $0x1f8] sm:$0xff]  ;;  %v2725_v26 = vpack.c.bf16 %v285_v20, %v284_v16  ;;  %v2695_v27 = vpack.c.bf16 %v271_v22, %v270_v21  ;;  %v254_v28 = vld [vmem:[#allocation7 + $0x70] sm:$0xff]  ;;  %v304_v33 = vld [vmem:[#allocation7 + $0x200] sm:$0xff] }
  0x80   : > { %2718 = vmatpush3.bf16.msra.mxu1 %v2717_v0  ;;  %2688 = vmatprep.subr.bf16.mxu0 %v2687_v1  ;;  %v255_v29 = vld [vmem:[#allocation7 + $0x78] sm:$0xff]  ;;  %v286_v30 = vld [vmem:[#allocation7 + $0x170] sm:$0xff]  ;;  %v2727_v31 = vpack.c.bf16 %v303_v24, %v302_v23  ;;  %v305_v34 = vld [vmem:[#allocation7 + $0x208] sm:$0xff] }
  0x81   : > { %2720 = vmatprep.subr.bf16.mxu1 %v2719_v5  ;;  %v287_v32 = vld [vmem:[#allocation7 + $0x178] sm:$0xff]  ;;  %v2697_v35 = vpack.c.bf16 %v255_v29, %v254_v28  ;;  %v2731_v39 = vpack.c.bf16 %v305_v34, %v304_v33  ;;  %v306_v40 = vld [vmem:[#allocation7 + $0x210] sm:$0xff]  ;;  %v308_v44 = vld [vmem:[#allocation7 + $0x220] sm:$0xff] }
  0x82   : > { %v2729_v36 = vpack.c.bf16 %v287_v32, %v286_v30  ;;  %v307_v41 = vld [vmem:[#allocation7 + $0x218] sm:$0xff]  ;;  %v309_v45 = vld [vmem:[#allocation7 + $0x228] sm:$0xff]  ;;  %v310_v50 = vld [vmem:[#allocation7 + $0x230] sm:$0xff] }
  0x83   : > { %2690 = vmatpush3.bf16.msra.mxu0 %v2689_v11  ;;  %v2735_v43 = vpack.c.bf16 %v307_v41, %v306_v40  ;;  %v2739_v49 = vpack.c.bf16 %v309_v45, %v308_v44  ;;  %v311_v51 = vld [vmem:[#allocation7 + $0x238] sm:$0xff]  ;;  %v312_v54 = vld [vmem:[#allocation7 + $0x240] sm:$0xff]  ;;  %v313_v55 = vld [vmem:[#allocation7 + $0x248] sm:$0xff] }
  0x84   : > { %2722 = vmatpush3.bf16.msra.mxu1 %v2721_v14  ;;  %2692 = vmatprep.subr.bf16.mxu0 %v2691_v15  ;;  %v2743_v53 = vpack.c.bf16 %v311_v51, %v310_v50  ;;  %v2747_v56 = vpack.c.bf16 %v313_v55, %v312_v54  ;;  %v314_v57 = vld [vmem:[#allocation7 + $0x250] sm:$0xff]  ;;  %v315_v58 = vld [vmem:[#allocation7 + $0x258] sm:$0xff]  ;;  %v316_v60 = vld [vmem:[#allocation7 + $0x260] sm:$0xff] }
  0x85   : > { %2724 = vmatprep.subr.bf16.mxu1 %v2723_v19  ;;  %v237_v47 = vld [vmem:[#allocation2 + $0x11] sm:$0xff]  ;;  %v2751_v59 = vpack.c.bf16 %v315_v58, %v314_v57  ;;  %v317_v61 = vld [vmem:[#allocation7 + $0x268] sm:$0xff]  ;;  %v589_v3 = vld [vmem:[#allocation7 + $0x300] sm:$0xff] }
  0x86   : > { %v232_v37 = vld [vmem:[#allocation2 + $0x7] sm:$0xff]  ;;  %v233_v46 = vld [vmem:[#allocation2 + $0xf] sm:$0xff]  ;;  %v2755_v62 = vpack.c.bf16 %v317_v61, %v316_v60  ;;  %v319_v0 = vld [vmem:[#allocation7 + $0x278] sm:$0xff] }
  0x87   : > { %2694 = vmatpush3.bf16.msra.mxu0 %v2693_v25  ;;  %v236_v38 = vld [vmem:[#allocation2 + $0x9] sm:$0xff]  ;;  %384 = vmatprep.mubr.f32.mxu0 %v232_v37  ;;  %v239_v2 = vld [vmem:[#allocation2 + $0x12] sm:$0xff]  ;;  %v573_v6 = vld [vmem:[#allocation7 + $0x280] sm:$0xff] }
  0x88   : > { %2726 = vmatpush3.bf16.msra.mxu1 %v2725_v26  ;;  %2696 = vmatprep.subr.bf16.mxu0 %v2695_v27  ;;  %v230_v42 = vld [vmem:[#allocation2 + $0x6] sm:$0xff]  ;;  %v231_v48 = vld [vmem:[#allocation2 + $0xe] sm:$0xff]  ;;  %v592_v16 = vld [vmem:[#allocation7 + $0x318] sm:$0xff] }
  0x89   : > { %2728 = vmatprep.subr.bf16.mxu1 %v2727_v31  ;;  %459 = vmatprep.mubr.f32.mxu1 %v236_v38  ;;  %v238_v52 = vld [vmem:[#allocation2 + $0xa] sm:$0xff]  ;;  %v621_v8 = vld [vmem:[#allocation7 + $0x400] sm:$0xff]  ;;  %v576_v19 = vld [vmem:[#allocation7 + $0x298] sm:$0xff] }
  0x8a   : > { %v318_v63 = vld [vmem:[#allocation7 + $0x270] sm:$0xff]  ;;  %v590_v4 = vld [vmem:[#allocation7 + $0x308] sm:$0xff]  ;;  %v605_v11 = vld [vmem:[#allocation7 + $0x380] sm:$0xff] }
  0x8b   : > { %2698 = vmatpush3.bf16.msra.mxu0 %v2697_v35  ;;  %v2759_v1 = vpack.c.bf16 %v319_v0, %v318_v63  ;;  %v2763_v5 = vpack.c.bf16 %v590_v4, %v589_v3  ;;  %v574_v7 = vld [vmem:[#allocation7 + $0x288] sm:$0xff]  ;;  %v591_v15 = vld [vmem:[#allocation7 + $0x310] sm:$0xff]  ;;  %v624_v22 = vld [vmem:[#allocation7 + $0x418] sm:$0xff] }
  0x8c   : > { %2730 = vmatpush3.bf16.msra.mxu1 %v2729_v36  ;;  %2732 = vmatprep.subr.bf16.mxu0 %v2731_v39  ;;  %v2765_v9 = vpack.c.bf16 %v574_v7, %v573_v6  ;;  %v622_v10 = vld [vmem:[#allocation7 + $0x408] sm:$0xff]  ;;  %v623_v20 = vld [vmem:[#allocation7 + $0x410] sm:$0xff]  ;;  %v608_v24 = vld [vmem:[#allocation7 + $0x398] sm:$0xff] }
  0x8d   : > { %2764 = vmatprep.subr.bf16.mxu1 %v2763_v5  ;;  %v606_v12 = vld [vmem:[#allocation7 + $0x388] sm:$0xff]  ;;  %v2795_v13 = vpack.c.bf16 %v622_v10, %v621_v8  ;;  %v607_v23 = vld [vmem:[#allocation7 + $0x390] sm:$0xff]  ;;  %v2799_v25 = vpack.c.bf16 %v624_v22, %v623_v20  ;;  %v593_v27 = vld [vmem:[#allocation7 + $0x320] sm:$0xff] }
  0x8e   : > { %385 = vmatmul.mubr.f32.vlgmr.msra.gmra.mrb[0].mxu0 %v230_v42  ;;  %v2797_v14 = vpack.c.bf16 %v606_v12, %v605_v11  ;;  %v2801_v26 = vpack.c.bf16 %v608_v24, %v607_v23  ;;  %v594_v28 = vld [vmem:[#allocation7 + $0x328] sm:$0xff]  ;;  %v577_v30 = vld [vmem:[#allocation7 + $0x2a0] sm:$0xff]  ;;  %v596_v40 = vld [vmem:[#allocation7 + $0x338] sm:$0xff] }
  0x8f   : > { %460 = vmatmul.mubr.f32.vlgmr.msra.gmra.mrb[0].mxu1 %v226_v17  ;;  %2734 = vmatpush3.bf16.msra.mxu0 %v2731_v39  ;;  %v2767_v17 = vpack.c.bf16 %v592_v16, %v591_v15  ;;  %v2771_v29 = vpack.c.bf16 %v594_v28, %v593_v27  ;;  %v578_v31 = vld [vmem:[#allocation7 + $0x2a8] sm:$0xff]  ;;  %v625_v32 = vld [vmem:[#allocation7 + $0x420] sm:$0xff]  ;;  %v595_v39 = vld [vmem:[#allocation7 + $0x330] sm:$0xff] }
  0x90   : > { %2736 = vmatprep.subr.bf16.mxu0 %v2735_v43  ;;  %389 = vmatprep.mubr.f32.mxu0 %v233_v46  ;;  %v2773_v33 = vpack.c.bf16 %v578_v31, %v577_v30  ;;  %v626_v34 = vld [vmem:[#allocation7 + $0x428] sm:$0xff]  ;;  %v609_v35 = vld [vmem:[#allocation7 + $0x3a0] sm:$0xff]  ;;  %v2775_v41 = vpack.c.bf16 %v596_v40, %v595_v39  ;;  %v579_v42 = vld [vmem:[#allocation7 + $0x2b0] sm:$0xff] }
  0x91   : > { %464 = vmatprep.mubr.f32.mxu1 %v237_v47  ;;  %2766 = vmatpush3.bf16.msra.mxu1 %v2765_v9  ;;  %v610_v36 = vld [vmem:[#allocation7 + $0x3a8] sm:$0xff]  ;;  %v2803_v37 = vpack.c.bf16 %v626_v34, %v625_v32  ;;  %v627_v44 = vld [vmem:[#allocation7 + $0x430] sm:$0xff]  ;;  %v628_v46 = vld [vmem:[#allocation7 + $0x438] sm:$0xff] }
  0x92   : > { %390 = vmatmul.mubr.f32.gmra.mrb[2].mxu0 %v231_v48  ;;  %2768 = vmatprep.subr.bf16.mxu1 %v2767_v17  ;;  %v2805_v38 = vpack.c.bf16 %v610_v36, %v609_v35  ;;  %v611_v47 = vld [vmem:[#allocation7 + $0x3b0] sm:$0xff]  ;;  %v612_v48 = vld [vmem:[#allocation7 + $0x3b8] sm:$0xff]  ;;  %v597_v51 = vld [vmem:[#allocation7 + $0x340] sm:$0xff] }
  0x93   : > { %2738 = vmatpush3.bf16.msra.mxu0 %v2735_v43  ;;  %465 = vmatmul.mubr.f32.gmra.mrb[2].mxu1 %v227_v18  ;;  %v575_v18 = vld [vmem:[#allocation7 + $0x290] sm:$0xff]  ;;  %v580_v43 = vld [vmem:[#allocation7 + $0x2b8] sm:$0xff]  ;;  %v2809_v50 = vpack.c.bf16 %v612_v48, %v611_v47  ;;  %v581_v54 = vld [vmem:[#allocation7 + $0x2c0] sm:$0xff] }
  0x94   : > { %2740 = vmatprep.subr.bf16.mxu0 %v2739_v49  ;;  %2524 = vmatprep.mubr.f32.mxu0 %v238_v52  ;;  %v2769_v21 = vpack.c.bf16 %v576_v19, %v575_v18  ;;  %v2777_v45 = vpack.c.bf16 %v580_v43, %v579_v42  ;;  %v598_v52 = vld [vmem:[#allocation7 + $0x348] sm:$0xff]  ;;  %v599_v63 = vld [vmem:[#allocation7 + $0x350] sm:$0xff]  ;;  %v600_v0 = vld [vmem:[#allocation7 + $0x358] sm:$0xff] }
  0x95   : > { %v582_v55 = vld [vmem:[#allocation7 + $0x2c8] sm:$0xff]  ;;  %v584_v3 = vld [vmem:[#allocation7 + $0x2d8] sm:$0xff]  ;;  %v631_v4 = vld [vmem:[#allocation7 + $0x450] sm:$0xff] }
  0x96   : > { %2770 = vmatpush3.bf16.msra.mxu1 %v2769_v21  ;;  %v2781_v57 = vpack.c.bf16 %v582_v55, %v581_v54  ;;  %v630_v58 = vld [vmem:[#allocation7 + $0x448] sm:$0xff]  ;;  %v632_v6 = vld [vmem:[#allocation7 + $0x458] sm:$0xff]  ;;  %v615_v7 = vld [vmem:[#allocation7 + $0x3d0] sm:$0xff] }
  0x97   : > { %2742 = vmatpush3.bf16.msra.mxu0 %v2739_v49  ;;  %2772 = vmatprep.subr.bf16.mxu1 %v2771_v29  ;;  %v2807_v49 = vpack.c.bf16 %v628_v46, %v627_v44  ;;  %v614_v60 = vld [vmem:[#allocation7 + $0x3c8] sm:$0xff]  ;;  %v616_v8 = vld [vmem:[#allocation7 + $0x3d8] sm:$0xff]  ;;  %v2815_v9 = vpack.c.bf16 %v632_v6, %v631_v4  ;;  %v601_v11 = vld [vmem:[#allocation7 + $0x360] sm:$0xff] }
  0x98   : > { %2744 = vmatprep.subr.bf16.mxu0 %v2743_v53  ;;  %v2817_v10 = vpack.c.bf16 %v616_v8, %v615_v7  ;;  %v602_v12 = vld [vmem:[#allocation7 + $0x368] sm:$0xff]  ;;  %v633_v16 = vld [vmem:[#allocation7 + $0x460] sm:$0xff]  ;;  %v603_v23 = vld [vmem:[#allocation7 + $0x370] sm:$0xff] }
  0x99   : > { %v586_v15 = vld [vmem:[#allocation7 + $0x2e8] sm:$0xff]  ;;  %v617_v19 = vld [vmem:[#allocation7 + $0x3e0] sm:$0xff]  ;;  %v604_v24 = vld [vmem:[#allocation7 + $0x378] sm:$0xff] }
  0x9a   : > { %2774 = vmatpush3.bf16.msra.mxu1 %v2773_v33  ;;  %v634_v18 = vld [vmem:[#allocation7 + $0x468] sm:$0xff]  ;;  %v588_v27 = vld [vmem:[#allocation7 + $0x2f8] sm:$0xff]  ;;  %v635_v28 = vld [vmem:[#allocation7 + $0x470] sm:$0xff] }
  0x9b   : > { %2746 = vmatpush3.bf16.msra.mxu0 %v2743_v53  ;;  %2776 = vmatprep.subr.bf16.mxu1 %v2775_v41  ;;  %v2779_v53 = vpack.c.bf16 %v598_v52, %v597_v51  ;;  %v618_v20 = vld [vmem:[#allocation7 + $0x3e8] sm:$0xff]  ;;  %v2819_v21 = vpack.c.bf16 %v634_v18, %v633_v16  ;;  %v636_v29 = vld [vmem:[#allocation7 + $0x478] sm:$0xff]  ;;  %v619_v32 = vld [vmem:[#allocation7 + $0x3f0] sm:$0xff]  ;;  %v546_v52 = vlaneseq }
  0x9c   : > { %2748 = vmatprep.subr.bf16.mxu0 %v2747_v56  ;;  %v2821_v22 = vpack.c.bf16 %v618_v20, %v617_v19  ;;  %v2823_v31 = vpack.c.bf16 %v636_v29, %v635_v28  ;;  %v620_v33 = vld [vmem:[#allocation7 + $0x3f8] sm:$0xff]  ;;  %v637_v35 = vld [vmem:[#allocation7 + $0x480] sm:$0xff]  ;;  %v638_v36 = vld [vmem:[#allocation7 + $0x488] sm:$0xff] }
  0x9d   : > { %v2825_v34 = vpack.c.bf16 %v620_v33, %v619_v32  ;;  %v545_v55 = vld [vmem:[#allocation9] sm:$0x3]  ;;  %v640_v6 = vld [vmem:[#allocation7 + $0x498] sm:$0xff]  ;;  %v650_v28 = vld [vmem:[#allocation7 + $0x4e8] sm:$0xff] }
  0x9e   : > { %2778 = vmatpush3.bf16.msra.mxu1 %v2777_v45  ;;  %v644_v18 = vld [vmem:[#allocation7 + $0x4b8] sm:$0xff] }
  0x9f   : > { %2750 = vmatpush3.bf16.msra.mxu0 %v2747_v56  ;;  %v629_v56 = vld [vmem:[#allocation7 + $0x440] sm:$0xff]  ;;  %2780 = vmatprep.subr.bf16.mxu1 %v2779_v53  ;;  %v547_v53 = vshrl.u32 %v546_v52, 7 }
  0xa0   : > { %2752 = vmatprep.subr.bf16.mxu0 %v2751_v59  ;;  %v2811_v61 = vpack.c.bf16 %v630_v58, %v629_v56 }
  0xa1   : > { %v3622_v54 = vsub.s32 0, %v547_v53  ;;  %v3624_v56 = vsub.s32 1, %v547_v53  ;;  %v958_v53 = vld [vmem:[#allocation7 + $0x698] sm:$0xff] }
  0xa2   : > { %2782 = vmatpush3.bf16.msra.mxu1 %v2781_v57 }
  0xa3   : > { %2754 = vmatpush3.bf16.msra.mxu0 %v2751_v59  ;;  %v613_v59 = vld [vmem:[#allocation7 + $0x3c0] sm:$0xff]  ;;  %v549_v57 = vrot.slane %v545_v55, %v3622_v54 }
  0xa4   : > { %2756 = vmatprep.subr.bf16.mxu0 %v2755_v62 }
  0xa7   : > { %2758 = vmatpush3.bf16.msra.mxu0 %v2755_v62  ;;  %v2813_v62 = vpack.c.bf16 %v614_v60, %v613_v59  ;;  %v555_v60 = vrot.slane %v545_v55, %v3624_v56  ;;  %v941_v55 = vld [vmem:[#allocation7 + $0x610] sm:$0xff] }
  0xa8   : > { %2760 = vmatprep.subr.bf16.mxu0 %v2759_v1 }
  0xab   : > { %2762 = vmatpush3.bf16.msra.mxu0 %v2759_v1  ;;  %v2783_v1 = vpack.c.bf16 %v600_v0, %v599_v63 }
  0xac   : > { %2796 = vmatprep.subr.bf16.mxu0 %v2795_v13  ;;  %v2787_v13 = vpack.c.bf16 %v602_v12, %v601_v11  ;;  %v641_v11 = vld [vmem:[#allocation7 + $0x4a0] sm:$0xff]  ;;  %v642_v12 = vld [vmem:[#allocation7 + $0x4a8] sm:$0xff] }
  0xad   : > { %2784 = vmatprep.subr.bf16.mxu1 %v2783_v1 }
  0xae   : > { %2525 = vmatmul.mubr.f32.vlgmr.msra.gmra.mrb[4].mxu0 %v239_v2  ;;  %v583_v2 = vld [vmem:[#allocation7 + $0x2d0] sm:$0xff] }
  0xaf   : > { %2798 = vmatpush3.bf16.msra.mxu0 %v2797_v14  ;;  %v2785_v5 = vpack.c.bf16 %v584_v3, %v583_v2  ;;  %v585_v14 = vld [vmem:[#allocation7 + $0x2e0] sm:$0xff] }
  0xb0   : > { %2800 = vmatprep.subr.bf16.mxu0 %v2799_v25  ;;  %v2789_v17 = vpack.c.bf16 %v586_v15, %v585_v14  ;;  %v587_v25 = vld [vmem:[#allocation7 + $0x2f0] sm:$0xff]  ;;  %v2835_v15 = vpack.c.bf16 %v642_v12, %v641_v11  ;;  %v914_v12 = vld [vmem:[#allocation7 + $0x538] sm:$0xff] }
  0xb1   : > { %2786 = vmatpush3.bf16.msra.mxu1 %v2785_v5  ;;  %v2793_v30 = vpack.c.bf16 %v588_v27, %v587_v25  ;;  %v639_v5 = vld [vmem:[#allocation7 + $0x490] sm:$0xff]  ;;  %v648_v25 = vld [vmem:[#allocation7 + $0x4d8] sm:$0xff]  ;;  %v649_v27 = vld [vmem:[#allocation7 + $0x4e0] sm:$0xff] }
  0xb2   : > { %2788 = vmatprep.subr.bf16.mxu1 %v2787_v13  ;;  %v2851_v29 = vpack.c.bf16 %v650_v28, %v649_v27  ;;  %v913_v11 = vld [vmem:[#allocation7 + $0x530] sm:$0xff]  ;;  %v964_v27 = vld [vmem:[#allocation7 + $0x6c8] sm:$0xff]  ;;  %v947_v28 = vld [vmem:[#allocation7 + $0x640] sm:$0xff] }
  0xb3   : > { %2802 = vmatpush3.bf16.msra.mxu0 %v2801_v26  ;;  %v2791_v26 = vpack.c.bf16 %v604_v24, %v603_v23  ;;  %v647_v24 = vld [vmem:[#allocation7 + $0x4d0] sm:$0xff] }
  0xb4   : > { %2804 = vmatprep.subr.bf16.mxu0 %v2803_v37  ;;  %v2827_v37 = vpack.c.bf16 %v638_v36, %v637_v35  ;;  %v924_v35 = vld [vmem:[#allocation7 + $0x588] sm:$0xff]  ;;  %v907_v36 = vld [vmem:[#allocation7 + $0x500] sm:$0xff] }
  0xb5   : > { %2790 = vmatpush3.bf16.msra.mxu1 %v2789_v17  ;;  %v643_v17 = vld [vmem:[#allocation7 + $0x4b0] sm:$0xff] }
  0xb6   : > { %2792 = vmatprep.subr.bf16.mxu1 %v2791_v26  ;;  %v2839_v20 = vpack.c.bf16 %v644_v18, %v643_v17  ;;  %v2847_v26 = vpack.c.bf16 %v648_v25, %v647_v24  ;;  %v946_v17 = vld [vmem:[#allocation7 + $0x638] sm:$0xff]  ;;  %v916_v24 = vld [vmem:[#allocation7 + $0x548] sm:$0xff]  ;;  %v963_v25 = vld [vmem:[#allocation7 + $0x6c0] sm:$0xff] }
  0xb7   : > { %2806 = vmatpush3.bf16.msra.mxu0 %v2805_v38 }
  0xb8   : > { %2808 = vmatprep.subr.bf16.mxu0 %v2807_v49 }
  0xb9   : > { %2794 = vmatpush3.bf16.msra.mxu1 %v2793_v30  ;;  %v651_v30 = vld [vmem:[#allocation7 + $0x4f0] sm:$0xff] }
  0xba   : > { %2828 = vmatprep.subr.bf16.mxu1 %v2827_v37 }
  0xbb   : > { %2810 = vmatpush3.bf16.msra.mxu0 %v2809_v50 }
  0xbc   : > { %2812 = vmatprep.subr.bf16.mxu0 %v2811_v61 }
  0xbf   : > { %2814 = vmatpush3.bf16.msra.mxu0 %v2813_v62 }
  0xc0   : > { %2816 = vmatprep.subr.bf16.mxu0 %v2815_v9 }
  0xc3   : > { %2818 = vmatpush3.bf16.msra.mxu0 %v2817_v10  ;;  %v2831_v10 = vpack.c.bf16 %v640_v6, %v639_v5  ;;  %v944_v5 = vld [vmem:[#allocation7 + $0x628] sm:$0xff] }
  0xc4   : > { %2820 = vmatprep.subr.bf16.mxu0 %v2819_v21  ;;  %v645_v21 = vld [vmem:[#allocation7 + $0x4c0] sm:$0xff] }
  0xc7   : > { %2822 = vmatpush3.bf16.msra.mxu0 %v2821_v22  ;;  %v646_v22 = vld [vmem:[#allocation7 + $0x4c8] sm:$0xff] }
  0xc8   : > { %2824 = vmatprep.subr.bf16.mxu0 %v2823_v31  ;;  %v2843_v23 = vpack.c.bf16 %v646_v22, %v645_v21  ;;  %v652_v31 = vld [vmem:[#allocation7 + $0x4f8] sm:$0xff]  ;;  %v932_v21 = vld [vmem:[#allocation7 + $0x5c8] sm:$0xff] }
  0xc9   : > { %v2855_v32 = vpack.c.bf16 %v652_v31, %v651_v30  ;;  %v2907_v30 = vpack.c.bf16 %v964_v27, %v963_v25 }
  0xcb   : > { %2826 = vmatpush3.bf16.msra.mxu0 %v2825_v34  ;;  %v923_v34 = vld [vmem:[#allocation7 + $0x580] sm:$0xff] }
 0x161   : > { %v2054_v38 = vpop.f32.mrb[0].mxu0 }
 0x162   : > { %v2092_v39 = vpop.f32.mrb[0].mxu1  ;;  %v2055_v40 = vpop.f32.mrb[1].mxu0 }
 0x163   : > { %v2056_v41 = vadd.f32 %v2055_v40, %v2054_v38  ;;  %v2093_v42 = vpop.f32.mrb[1].mxu1  ;;  %v908_v38 = vld [vmem:[#allocation7 + $0x508] sm:$0xff] }
 0x164   : > { %v2094_v43 = vadd.f32 %v2093_v42, %v2092_v39  ;;  %v955_v39 = vld [vmem:[#allocation7 + $0x680] sm:$0xff]  ;;  %v956_v40 = vld [vmem:[#allocation7 + $0x688] sm:$0xff] }
 0x165   : > { %v2057_v44 = vpop.f32.mrb[2].mxu0  ;;  %v2891_v42 = vpack.c.bf16 %v956_v40, %v955_v39  ;;  %v966_v39 = vld [vmem:[#allocation7 + $0x6d8] sm:$0xff]  ;;  %v949_v40 = vld [vmem:[#allocation7 + $0x650] sm:$0xff] }
 0x166   : > { %v2095_v45 = vpop.f32.mrb[2].mxu1  ;;  %v2058_v46 = vpop.f32.mrb[3].mxu0  ;;  %v462_v47 = vadd.f32 %v2094_v43, %v2056_v41  ;;  %v2861_v41 = vpack.c.bf16 %v908_v38, %v907_v36  ;;  %v939_v43 = vld [vmem:[#allocation7 + $0x600] sm:$0xff]  ;;  %v918_v36 = vld [vmem:[#allocation7 + $0x558] sm:$0xff] }
 0x167   : > { %v2059_v48 = vadd.f32 %v2058_v46, %v2057_v44  ;;  %v2096_v49 = vpop.f32.mrb[3].mxu1  ;;  %v940_v44 = vld [vmem:[#allocation7 + $0x608] sm:$0xff] }
 0x168   : > { %v2097_v50 = vadd.f32 %v2096_v49, %v2095_v45  ;;  %v925_v45 = vld [vmem:[#allocation7 + $0x590] sm:$0xff]  ;;  %v2893_v46 = vpack.c.bf16 %v940_v44, %v939_v43  ;;  %v935_v44 = vld [vmem:[#allocation7 + $0x5e0] sm:$0xff] }
 0x169   : > { %v909_v49 = vld [vmem:[#allocation7 + $0x510] sm:$0xff] }
 0x16a   : > { %v467_v51 = vadd.f32 %v2097_v50, %v2059_v48  ;;  %v910_v50 = vld [vmem:[#allocation7 + $0x518] sm:$0xff] }
 0x16b   : > { %v2865_v52 = vpack.c.bf16 %v910_v50, %v909_v49  ;;  %v967_v49 = vld [vmem:[#allocation7 + $0x6e0] sm:$0xff] }
 0x181   : > { %v2526_v58 = vpop.f32.mrb[4].mxu0 }
 0x182   : > { %v542_v59 = vadd.f32 %v2526_v58, %v467_v51  ;;  %v536_v61 = vpop.f32.mrb[5].mxu0  ;;  %v957_v51 = vld [vmem:[#allocation7 + $0x690] sm:$0xff] }
 0x183   : > { %v537_v62 = vadd.f32 %v536_v61, %v462_v47  ;;  %v926_v47 = vld [vmem:[#allocation7 + $0x598] sm:$0xff]  ;;  %v2895_v58 = vpack.c.bf16 %v958_v53, %v957_v51  ;;  %v928_v61 = vld [vmem:[#allocation7 + $0x5a8] sm:$0xff] }
 0x184   : > { %v551_v63 = vmul.f32 %v549_v57, %v542_v59  ;;  %v2863_v48 = vpack.c.bf16 %v926_v47, %v925_v45  ;;  %v936_v45 = vld [vmem:[#allocation7 + $0x5e8] sm:$0xff]  ;;  %v919_v47 = vld [vmem:[#allocation7 + $0x560] sm:$0xff] }
 0x185   : > { %v550_v0 = vmul.f32 %v549_v57, %v537_v62  ;;  %v942_v57 = vld [vmem:[#allocation7 + $0x618] sm:$0xff]  ;;  %v968_v51 = vld [vmem:[#allocation7 + $0x6e8] sm:$0xff] }
 0x186   : > { %v557_v1 = vadd.f32 %v555_v60, %v551_v63  ;;  %v2897_v59 = vpack.c.bf16 %v942_v57, %v941_v55  ;;  %v911_v63 = vld [vmem:[#allocation7 + $0x520] sm:$0xff]  ;;  %v952_v53 = vld [vmem:[#allocation7 + $0x668] sm:$0xff]  ;;  %v2915_v55 = vpack.c.bf16 %v968_v51, %v967_v49  ;;  %v978_v49 = vld [vmem:[#allocation7 + $0x738] sm:$0xff] }
 0x187   : > { %v556_v2 = vadd.f32 %v555_v60, %v550_v0  ;;  %v927_v60 = vld [vmem:[#allocation7 + $0x5a0] sm:$0xff]  ;;  %v912_v0 = vld [vmem:[#allocation7 + $0x528] sm:$0xff] }
 0x188   : > { %3221 = vtanh.f32 %v557_v1  ;;  %v2867_v62 = vpack.c.bf16 %v928_v61, %v927_v60  ;;  %v959_v1 = vld [vmem:[#allocation7 + $0x6a0] sm:$0xff]  ;;  %v921_v60 = vld [vmem:[#allocation7 + $0x570] sm:$0xff] }
 0x189   : > { %3223 = vtanh.f32 %v556_v2  ;;  %v2869_v2 = vpack.c.bf16 %v912_v0, %v911_v63  ;;  %v969_v63 = vld [vmem:[#allocation7 + $0x6f0] sm:$0xff]  ;;  %v970_v0 = vld [vmem:[#allocation7 + $0x6f8] sm:$0xff] }
 0x192   : > { %v3222_v3 = vpop.eup %3221 }
 0x193   : > { %v3224_v4 = vpop.eup %3223  ;;  %561 = vst [vmem:[#allocation3 + $0x10] sm:$0xff] %v3222_v3 }
 0x194   : > { %560 = vst [vmem:[#allocation3 + $0x8] sm:$0xff] %v3224_v4 }
 0x19a   : > { %v569_v14 = vld [vmem:[#allocation3 + $0x11] sm:$0xff] }
 0x19b   : > { %v564_v7 = vld [vmem:[#allocation3 + $0x7] sm:$0xff]  ;;  %v565_v13 = vld [vmem:[#allocation3 + $0xf] sm:$0xff] }
 0x19c   : > { %v568_v8 = vld [vmem:[#allocation3 + $0x9] sm:$0xff]  ;;  %717 = vmatprep.mubr.f32.mxu1 %v564_v7  ;;  %v571_v33 = vld [vmem:[#allocation3 + $0x12] sm:$0xff] }
 0x19d   : > { %v562_v9 = vld [vmem:[#allocation3 + $0x6] sm:$0xff]  ;;  %792 = vmatprep.mubr.f32.mxu0 %v568_v8  ;;  %v563_v16 = vld [vmem:[#allocation3 + $0xe] sm:$0xff] }
 0x19e   : > { %718 = vmatmul.mubr.f32.vlgmr.msra.gmra.mrb[4].mxu1 %v562_v9  ;;  %793 = vmatmul.mubr.f32.vlgmr.msra.gmra.mrb[6].mxu0 %v3224_v4  ;;  %v570_v19 = vld [vmem:[#allocation3 + $0xa] sm:$0xff]  ;;  %v943_v4 = vld [vmem:[#allocation7 + $0x620] sm:$0xff]  ;;  %v930_v9 = vld [vmem:[#allocation7 + $0x5b8] sm:$0xff] }
 0x19f   : > { %2830 = vmatpush3.bf16.msra.mxu1 %v2827_v37  ;;  %722 = vmatprep.mubr.f32.mxu1 %v565_v13  ;;  %v2859_v37 = vpack.c.bf16 %v924_v35, %v923_v34  ;;  %v2901_v7 = vpack.c.bf16 %v944_v5, %v943_v4  ;;  %v929_v8 = vld [vmem:[#allocation7 + $0x5b0] sm:$0xff]  ;;  %v954_v4 = vld [vmem:[#allocation7 + $0x678] sm:$0xff] }
 0x1a0   : > { %797 = vmatprep.mubr.f32.mxu0 %v569_v14  ;;  %2832 = vmatprep.subr.bf16.mxu1 %v2831_v10  ;;  %v961_v13 = vld [vmem:[#allocation7 + $0x6b0] sm:$0xff]  ;;  %v2873_v14 = vpack.c.bf16 %v914_v12, %v913_v11 }
 0x1a1   : > { %2860 = vmatprep.subr.bf16.mxu0 %v2859_v37  ;;  %v917_v35 = vld [vmem:[#allocation7 + $0x550] sm:$0xff] }
 0x1a2   : > { %723 = vmatmul.mubr.f32.gmra.mrb[6].mxu1 %v563_v16  ;;  %798 = vmatmul.mubr.f32.gmra.mrb[8].mxu0 %v3222_v3  ;;  %v960_v3 = vld [vmem:[#allocation7 + $0x6a8] sm:$0xff]  ;;  %v945_v16 = vld [vmem:[#allocation7 + $0x630] sm:$0xff]  ;;  %v2881_v38 = vpack.c.bf16 %v918_v36, %v917_v35 }
 0x1a3   : > { %2834 = vmatpush3.bf16.msra.mxu1 %v2831_v10  ;;  %2559 = vmatprep.mubr.f32.mxu1 %v570_v19  ;;  %v2899_v6 = vpack.c.bf16 %v960_v3, %v959_v1  ;;  %v2871_v10 = vpack.c.bf16 %v930_v9, %v929_v8  ;;  %v2905_v19 = vpack.c.bf16 %v946_v17, %v945_v16  ;;  %v965_v37 = vld [vmem:[#allocation7 + $0x6d0] sm:$0xff] }
 0x1a4   : > { %2836 = vmatprep.subr.bf16.mxu1 %v2835_v15  ;;  %2862 = vmatpush3.bf16.msra.mxu0 %v2861_v41  ;;  %v950_v41 = vld [vmem:[#allocation7 + $0x658] sm:$0xff]  ;;  %v953_v3 = vld [vmem:[#allocation7 + $0x670] sm:$0xff] }
 0x1a5   : > { %2864 = vmatprep.subr.bf16.mxu0 %v2863_v48  ;;  %v2913_v43 = vpack.c.bf16 %v950_v41, %v949_v40  ;;  %v920_v48 = vld [vmem:[#allocation7 + $0x568] sm:$0xff]  ;;  %v2921_v5 = vpack.c.bf16 %v954_v4, %v953_v3  ;;  %v973_v36 = vld [vmem:[#allocation7 + $0x710] sm:$0xff]  ;;  %v1257_v3 = vld [vmem:[#allocation7 + $0x800] sm:$0xff] }
 0x1a6   : > { %v2885_v50 = vpack.c.bf16 %v920_v48, %v919_v47  ;;  %v977_v48 = vld [vmem:[#allocation7 + $0x730] sm:$0xff]  ;;  %v1258_v4 = vld [vmem:[#allocation7 + $0x808] sm:$0xff] }
 0x1a7   : > { %2838 = vmatpush3.bf16.msra.mxu1 %v2835_v15  ;;  %v962_v15 = vld [vmem:[#allocation7 + $0x6b8] sm:$0xff]  ;;  %v2935_v51 = vpack.c.bf16 %v978_v49, %v977_v48 }
 0x1a8   : > { %2840 = vmatprep.subr.bf16.mxu1 %v2839_v20  ;;  %2866 = vmatpush3.bf16.msra.mxu0 %v2865_v52  ;;  %v2903_v18 = vpack.c.bf16 %v962_v15, %v961_v13  ;;  %v951_v52 = vld [vmem:[#allocation7 + $0x660] sm:$0xff]  ;;  %v1280_v48 = vld [vmem:[#allocation7 + $0x8b8] sm:$0xff] }
 0x1a9   : > { %2868 = vmatprep.subr.bf16.mxu0 %v2867_v62  ;;  %v2917_v57 = vpack.c.bf16 %v952_v53, %v951_v52  ;;  %v922_v62 = vld [vmem:[#allocation7 + $0x578] sm:$0xff]  ;;  %v979_v52 = vld [vmem:[#allocation7 + $0x740] sm:$0xff]  ;;  %v980_v53 = vld [vmem:[#allocation7 + $0x748] sm:$0xff] }
 0x1aa   : > { %v2889_v1 = vpack.c.bf16 %v922_v62, %v921_v60  ;;  %v983_v60 = vld [vmem:[#allocation7 + $0x760] sm:$0xff] }
 0x1ab   : > { %2842 = vmatpush3.bf16.msra.mxu1 %v2839_v20  ;;  %v931_v20 = vld [vmem:[#allocation7 + $0x5c0] sm:$0xff] }
 0x1ac   : > { %2844 = vmatprep.subr.bf16.mxu1 %v2843_v23  ;;  %2870 = vmatpush3.bf16.msra.mxu0 %v2869_v2  ;;  %v2875_v22 = vpack.c.bf16 %v932_v21, %v931_v20  ;;  %v2919_v2 = vpack.c.bf16 %v970_v0, %v969_v63  ;;  %v985_v63 = vld [vmem:[#allocation7 + $0x770] sm:$0xff]  ;;  %v986_v0 = vld [vmem:[#allocation7 + $0x778] sm:$0xff] }
 0x1ad   : > { %2872 = vmatprep.subr.bf16.mxu0 %v2871_v10 }
 0x1af   : > { %2846 = vmatpush3.bf16.msra.mxu1 %v2843_v23  ;;  %v915_v23 = vld [vmem:[#allocation7 + $0x540] sm:$0xff] }
 0x1b0   : > { %2848 = vmatprep.subr.bf16.mxu1 %v2847_v26  ;;  %2874 = vmatpush3.bf16.msra.mxu0 %v2873_v14 }
 0x1b1   : > { %2876 = vmatprep.subr.bf16.mxu0 %v2875_v22 }
 0x1b3   : > { %2850 = vmatpush3.bf16.msra.mxu1 %v2847_v26  ;;  %v2877_v26 = vpack.c.bf16 %v916_v24, %v915_v23  ;;  %v879_v23 = vld [vmem:[#allocation9 + $0x2] sm:$0x3] }
 0x1b4   : > { %2852 = vmatprep.subr.bf16.mxu1 %v2851_v29  ;;  %v883_v24 = vrot.slane %v879_v23, %v3622_v54  ;;  %v889_v27 = vrot.slane %v879_v23, %v3624_v56  ;;  %v1275_v23 = vld [vmem:[#allocation7 + $0x890] sm:$0xff] }
 0x1b5   : > { %2878 = vmatpush3.bf16.msra.mxu0 %v2877_v26 }
 0x1b7   : > { %2854 = vmatpush3.bf16.msra.mxu1 %v2851_v29  ;;  %v948_v29 = vld [vmem:[#allocation7 + $0x648] sm:$0xff] }
 0x1b8   : > { %2856 = vmatprep.subr.bf16.mxu1 %v2855_v32  ;;  %v2909_v31 = vpack.c.bf16 %v948_v29, %v947_v28 }
 0x1bb   : > { %2858 = vmatpush3.bf16.msra.mxu1 %v2855_v32  ;;  %v933_v32 = vld [vmem:[#allocation7 + $0x5d0] sm:$0xff] }
 0x1bc   : > { %2892 = vmatprep.subr.bf16.mxu1 %v2891_v42  ;;  %v2911_v42 = vpack.c.bf16 %v966_v39, %v965_v37  ;;  %v974_v37 = vld [vmem:[#allocation7 + $0x718] sm:$0xff] }
 0x1bd   : > { %v2927_v41 = vpack.c.bf16 %v974_v37, %v973_v36  ;;  %v1278_v36 = vld [vmem:[#allocation7 + $0x8a8] sm:$0xff] }
 0x1be   : > { %2560 = vmatmul.mubr.f32.vlgmr.msra.gmra.mrb[8].mxu1 %v571_v33  ;;  %v934_v33 = vld [vmem:[#allocation7 + $0x5d8] sm:$0xff] }
 0x1bf   : > { %2894 = vmatpush3.bf16.msra.mxu1 %v2893_v46  ;;  %v2879_v34 = vpack.c.bf16 %v934_v33, %v933_v32  ;;  %v2883_v46 = vpack.c.bf16 %v936_v45, %v935_v44 }
 0x1c0   : > { %2896 = vmatprep.subr.bf16.mxu1 %v2895_v58  ;;  %v937_v58 = vld [vmem:[#allocation7 + $0x5f0] sm:$0xff] }
 0x1c1   : > { %2880 = vmatprep.subr.bf16.mxu0 %v2879_v34 }
 0x1c2   : > { %2882 = vmatpush3.bf16.msra.mxu0 %v2881_v38 }
 0x1c3   : > { %2898 = vmatpush3.bf16.msra.mxu1 %v2897_v59  ;;  %2884 = vmatprep.subr.bf16.mxu0 %v2883_v46  ;;  %v938_v59 = vld [vmem:[#allocation7 + $0x5f8] sm:$0xff] }
 0x1c4   : > { %2900 = vmatprep.subr.bf16.mxu1 %v2899_v6  ;;  %v2887_v61 = vpack.c.bf16 %v938_v59, %v937_v58  ;;  %v971_v6 = vld [vmem:[#allocation7 + $0x700] sm:$0xff]  ;;  %v982_v58 = vld [vmem:[#allocation7 + $0x758] sm:$0xff] }
 0x1c6   : > { %2886 = vmatpush3.bf16.msra.mxu0 %v2885_v50 }
 0x1c7   : > { %2902 = vmatpush3.bf16.msra.mxu1 %v2901_v7  ;;  %2888 = vmatprep.subr.bf16.mxu0 %v2887_v61  ;;  %v972_v7 = vld [vmem:[#allocation7 + $0x708] sm:$0xff] }
 0x1c8   : > { %2904 = vmatprep.subr.bf16.mxu1 %v2903_v18  ;;  %v2923_v8 = vpack.c.bf16 %v972_v7, %v971_v6  ;;  %v984_v61 = vld [vmem:[#allocation7 + $0x768] sm:$0xff]  ;;  %v2955_v6 = vpack.c.bf16 %v1258_v4, %v1257_v3  ;;  %v1251_v4 = vld [vmem:[#allocation7 + $0x7d0] sm:$0xff] }
 0x1c9   : > { %v2947_v62 = vpack.c.bf16 %v984_v61, %v983_v60  ;;  %v1242_v7 = vld [vmem:[#allocation7 + $0x788] sm:$0xff]  ;;  %v1281_v61 = vld [vmem:[#allocation7 + $0x8c0] sm:$0xff] }
 0x1ca   : > { %2890 = vmatpush3.bf16.msra.mxu0 %v2889_v1  ;;  %v2951_v1 = vpack.c.bf16 %v986_v0, %v985_v63  ;;  %v1298_v60 = vld [vmem:[#allocation7 + $0x948] sm:$0xff] }
 0x1cb   : > { %2906 = vmatpush3.bf16.msra.mxu1 %v2905_v19  ;;  %2924 = vmatprep.subr.bf16.mxu0 %v2923_v8 }
 0x1cc   : > { %2908 = vmatprep.subr.bf16.mxu1 %v2907_v30 }
 0x1cf   : > { %2910 = vmatpush3.bf16.msra.mxu1 %v2909_v31 }
 0x1d0   : > { %2912 = vmatprep.subr.bf16.mxu1 %v2911_v42  ;;  %v975_v42 = vld [vmem:[#allocation7 + $0x720] sm:$0xff] }
 0x1d3   : > { %2914 = vmatpush3.bf16.msra.mxu1 %v2913_v43  ;;  %v976_v43 = vld [vmem:[#allocation7 + $0x728] sm:$0xff] }
 0x1d4   : > { %2916 = vmatprep.subr.bf16.mxu1 %v2915_v55  ;;  %v2931_v46 = vpack.c.bf16 %v976_v43, %v975_v42  ;;  %v2939_v55 = vpack.c.bf16 %v980_v53, %v979_v52  ;;  %v1247_v42 = vld [vmem:[#allocation7 + $0x7b0] sm:$0xff]  ;;  %v1248_v43 = vld [vmem:[#allocation7 + $0x7b8] sm:$0xff]  ;;  %v1266_v52 = vld [vmem:[#allocation7 + $0x848] sm:$0xff] }
 0x1d7   : > { %2918 = vmatpush3.bf16.msra.mxu1 %v2917_v57  ;;  %v981_v57 = vld [vmem:[#allocation7 + $0x750] sm:$0xff] }
 0x1d8   : > { %2920 = vmatprep.subr.bf16.mxu1 %v2919_v2  ;;  %v2943_v59 = vpack.c.bf16 %v982_v58, %v981_v57  ;;  %v1250_v57 = vld [vmem:[#allocation7 + $0x7c8] sm:$0xff]  ;;  %v1297_v58 = vld [vmem:[#allocation7 + $0x940] sm:$0xff] }
 0x1d9   : > { %v3003_v63 = vpack.c.bf16 %v1298_v60, %v1297_v58 }
 0x1db   : > { %2922 = vmatpush3.bf16.msra.mxu1 %v2921_v5  ;;  %v1241_v5 = vld [vmem:[#allocation7 + $0x780] sm:$0xff] }
 0x1dc   : > { %2956 = vmatprep.subr.bf16.mxu1 %v2955_v6  ;;  %v1299_v6 = vld [vmem:[#allocation7 + $0x950] sm:$0xff] }
 0x271   : > { %v2148_v9 = vpop.f32.mrb[4].mxu1  ;;  %v2186_v10 = vpop.f32.mrb[6].mxu0 }
 0x272   : > { %v2149_v11 = vpop.f32.mrb[5].mxu1  ;;  %v2187_v12 = vpop.f32.mrb[7].mxu0 }
 0x273   : > { %v2150_v13 = vadd.f32 %v2149_v11, %v2148_v9  ;;  %v2188_v14 = vadd.f32 %v2187_v12, %v2186_v10  ;;  %v1290_v9 = vld [vmem:[#allocation7 + $0x908] sm:$0xff]  ;;  %v2957_v10 = vpack.c.bf16 %v1242_v7, %v1241_v5  ;;  %v1273_v12 = vld [vmem:[#allocation7 + $0x880] sm:$0xff]  ;;  %v1252_v5 = vld [vmem:[#allocation7 + $0x7d8] sm:$0xff] }
 0x274   : > { %v2977_v7 = vpack.c.bf16 %v1252_v5, %v1251_v4  ;;  %v1307_v5 = vld [vmem:[#allocation7 + $0x990] sm:$0xff] }
 0x275   : > { %v2151_v15 = vpop.f32.mrb[6].mxu1  ;;  %v2189_v16 = vpop.f32.mrb[8].mxu0  ;;  %v795_v17 = vadd.f32 %v2188_v14, %v2150_v13  ;;  %v1274_v13 = vld [vmem:[#allocation7 + $0x888] sm:$0xff]  ;;  %v1259_v14 = vld [vmem:[#allocation7 + $0x810] sm:$0xff] }
 0x276   : > { %v2152_v18 = vpop.f32.mrb[7].mxu1  ;;  %v2190_v19 = vpop.f32.mrb[9].mxu0 }
 0x277   : > { %v2153_v20 = vadd.f32 %v2152_v18, %v2151_v15  ;;  %v2191_v21 = vadd.f32 %v2190_v19, %v2189_v16  ;;  %v2989_v15 = vpack.c.bf16 %v1274_v13, %v1273_v12  ;;  %v1260_v16 = vld [vmem:[#allocation7 + $0x818] sm:$0xff]  ;;  %v1243_v18 = vld [vmem:[#allocation7 + $0x790] sm:$0xff]  ;;  %v1269_v13 = vld [vmem:[#allocation7 + $0x860] sm:$0xff] }
 0x278   : > { %v1244_v19 = vld [vmem:[#allocation7 + $0x798] sm:$0xff] }
 0x279   : > { %v800_v22 = vadd.f32 %v2191_v21, %v2153_v20  ;;  %v1291_v20 = vld [vmem:[#allocation7 + $0x910] sm:$0xff]  ;;  %v2961_v21 = vpack.c.bf16 %v1244_v19, %v1243_v18  ;;  %v1301_v18 = vld [vmem:[#allocation7 + $0x960] sm:$0xff] }
 0x291   : > { %v2561_v25 = vpop.f32.mrb[8].mxu1 }
 0x292   : > { %v875_v26 = vadd.f32 %v2561_v25, %v800_v22  ;;  %v869_v28 = vpop.f32.mrb[9].mxu1  ;;  %v1292_v22 = vld [vmem:[#allocation7 + $0x918] sm:$0xff] }
 0x293   : > { %v870_v29 = vadd.f32 %v869_v28, %v795_v17  ;;  %v2959_v17 = vpack.c.bf16 %v1260_v16, %v1259_v14  ;;  %v2991_v25 = vpack.c.bf16 %v1292_v22, %v1291_v20  ;;  %v1262_v28 = vld [vmem:[#allocation7 + $0x828] sm:$0xff]  ;;  %v1253_v16 = vld [vmem:[#allocation7 + $0x7e0] sm:$0xff] }
 0x294   : > { %v885_v30 = vmul.f32 %v883_v24, %v875_v26  ;;  %v1270_v14 = vld [vmem:[#allocation7 + $0x868] sm:$0xff] }
 0x295   : > { %v884_v31 = vmul.f32 %v883_v24, %v870_v29  ;;  %v1276_v24 = vld [vmem:[#allocation7 + $0x898] sm:$0xff]  ;;  %v1302_v20 = vld [vmem:[#allocation7 + $0x968] sm:$0xff] }
 0x296   : > { %v891_v32 = vadd.f32 %v889_v27, %v885_v30  ;;  %v2993_v26 = vpack.c.bf16 %v1276_v24, %v1275_v23  ;;  %v1245_v30 = vld [vmem:[#allocation7 + $0x7a0] sm:$0xff]  ;;  %v1286_v22 = vld [vmem:[#allocation7 + $0x8e8] sm:$0xff]  ;;  %v3011_v23 = vpack.c.bf16 %v1302_v20, %v1301_v18  ;;  %v1312_v18 = vld [vmem:[#allocation7 + $0x9b8] sm:$0xff] }
 0x297   : > { %v890_v33 = vadd.f32 %v889_v27, %v884_v31  ;;  %v1261_v27 = vld [vmem:[#allocation7 + $0x820] sm:$0xff]  ;;  %v1246_v31 = vld [vmem:[#allocation7 + $0x7a8] sm:$0xff] }
 0x298   : > { %3225 = vtanh.f32 %v891_v32  ;;  %v2963_v29 = vpack.c.bf16 %v1262_v28, %v1261_v27  ;;  %v1293_v32 = vld [vmem:[#allocation7 + $0x920] sm:$0xff]  ;;  %v1255_v27 = vld [vmem:[#allocation7 + $0x7f0] sm:$0xff] }
 0x299   : > { %3227 = vtanh.f32 %v890_v33  ;;  %v2965_v33 = vpack.c.bf16 %v1246_v31, %v1245_v30  ;;  %v1303_v30 = vld [vmem:[#allocation7 + $0x970] sm:$0xff]  ;;  %v1304_v31 = vld [vmem:[#allocation7 + $0x978] sm:$0xff] }
 0x2a2   : > { %v3226_v34 = vpop.eup %3225 }
 0x2a3   : > { %v3228_v35 = vpop.eup %3227  ;;  %895 = vst [vmem:[#allocation2 + $0x10] sm:$0xff] %v3226_v34 }
 0x2a4   : > { %894 = vst [vmem:[#allocation2 + $0x8] sm:$0xff] %v3228_v35 }
 0x2aa   : > { %v903_v45 = vld [vmem:[#allocation2 + $0x11] sm:$0xff] }
 0x2ab   : > { %v898_v38 = vld [vmem:[#allocation2 + $0x7] sm:$0xff]  ;;  %v899_v44 = vld [vmem:[#allocation2 + $0xf] sm:$0xff] }
 0x2ac   : > { %v902_v39 = vld [vmem:[#allocation2 + $0x9] sm:$0xff]  ;;  %1051 = vmatprep.mubr.f32.mxu0 %v898_v38  ;;  %v905_v2 = vld [vmem:[#allocation2 + $0x12] sm:$0xff] }
 0x2ad   : > { %v896_v40 = vld [vmem:[#allocation2 + $0x6] sm:$0xff]  ;;  %1126 = vmatprep.mubr.f32.mxu1 %v902_v39  ;;  %v897_v47 = vld [vmem:[#allocation2 + $0xe] sm:$0xff] }
 0x2ae   : > { %1052 = vmatmul.mubr.f32.vlgmr.msra.gmra.mrb[10].mxu0 %v896_v40  ;;  %1127 = vmatmul.mubr.f32.vlgmr.msra.gmra.mrb[10].mxu1 %v3228_v35  ;;  %v904_v50 = vld [vmem:[#allocation2 + $0xa] sm:$0xff]  ;;  %v1277_v35 = vld [vmem:[#allocation7 + $0x8a0] sm:$0xff]  ;;  %v1264_v40 = vld [vmem:[#allocation7 + $0x838] sm:$0xff] }
 0x2af   : > { %2926 = vmatpush3.bf16.msra.mxu0 %v2923_v8  ;;  %1056 = vmatprep.mubr.f32.mxu0 %v899_v44  ;;  %v1289_v8 = vld [vmem:[#allocation7 + $0x900] sm:$0xff]  ;;  %v2997_v38 = vpack.c.bf16 %v1278_v36, %v1277_v35  ;;  %v1263_v39 = vld [vmem:[#allocation7 + $0x830] sm:$0xff]  ;;  %v1288_v35 = vld [vmem:[#allocation7 + $0x8f8] sm:$0xff] }
 0x2b0   : > { %1131 = vmatprep.mubr.f32.mxu1 %v903_v45  ;;  %2928 = vmatprep.subr.bf16.mxu0 %v2927_v41  ;;  %v2987_v11 = vpack.c.bf16 %v1290_v9, %v1289_v8  ;;  %v1295_v44 = vld [vmem:[#allocation7 + $0x930] sm:$0xff]  ;;  %v2969_v45 = vpack.c.bf16 %v1248_v43, %v1247_v42  ;;  %v1300_v8 = vld [vmem:[#allocation7 + $0x958] sm:$0xff] }
 0x2b1   : > { %2958 = vmatpush3.bf16.msra.mxu1 %v2957_v10  ;;  %v1283_v9 = vld [vmem:[#allocation7 + $0x8d0] sm:$0xff]  ;;  %v1284_v10 = vld [vmem:[#allocation7 + $0x8d8] sm:$0xff] }
 0x2b2   : > { %1057 = vmatmul.mubr.f32.gmra.mrb[12].mxu0 %v897_v47  ;;  %1132 = vmatmul.mubr.f32.gmra.mrb[12].mxu1 %v3226_v34  ;;  %v1294_v34 = vld [vmem:[#allocation7 + $0x928] sm:$0xff]  ;;  %v1279_v47 = vld [vmem:[#allocation7 + $0x8b0] sm:$0xff]  ;;  %v3009_v12 = vpack.c.bf16 %v1284_v10, %v1283_v9 }
 0x2b3   : > { %2930 = vmatpush3.bf16.msra.mxu0 %v2927_v41  ;;  %2594 = vmatprep.mubr.f32.mxu0 %v904_v50  ;;  %v2995_v37 = vpack.c.bf16 %v1294_v34, %v1293_v32  ;;  %v2967_v41 = vpack.c.bf16 %v1264_v40, %v1263_v39  ;;  %v3001_v50 = vpack.c.bf16 %v1280_v48, %v1279_v47  ;;  %v1287_v34 = vld [vmem:[#allocation7 + $0x8f0] sm:$0xff] }
 0x2b4   : > { %2932 = vmatprep.subr.bf16.mxu0 %v2931_v46  ;;  %2960 = vmatprep.subr.bf16.mxu1 %v2959_v17  ;;  %v1254_v17 = vld [vmem:[#allocation7 + $0x7e8] sm:$0xff]  ;;  %v3017_v36 = vpack.c.bf16 %v1288_v35, %v1287_v34  ;;  %v1591_v34 = vld [vmem:[#allocation7 + $0xa80] sm:$0xff] }
 0x2b5   : > { %2962 = vmatpush3.bf16.msra.mxu1 %v2961_v21  ;;  %v2981_v19 = vpack.c.bf16 %v1254_v17, %v1253_v16  ;;  %v1285_v21 = vld [vmem:[#allocation7 + $0x8e0] sm:$0xff]  ;;  %v1311_v17 = vld [vmem:[#allocation7 + $0x9b0] sm:$0xff]  ;;  %v1592_v35 = vld [vmem:[#allocation7 + $0xa88] sm:$0xff] }
 0x2b6   : > { %2964 = vmatprep.subr.bf16.mxu1 %v2963_v29  ;;  %v3013_v24 = vpack.c.bf16 %v1286_v22, %v1285_v21  ;;  %v1256_v29 = vld [vmem:[#allocation7 + $0x7f8] sm:$0xff]  ;;  %v3031_v20 = vpack.c.bf16 %v1312_v18, %v1311_v17  ;;  %v1313_v21 = vld [vmem:[#allocation7 + $0x9c0] sm:$0xff]  ;;  %v1314_v22 = vld [vmem:[#allocation7 + $0x9c8] sm:$0xff] }
 0x2b7   : > { %2934 = vmatpush3.bf16.msra.mxu0 %v2931_v46  ;;  %v1296_v46 = vld [vmem:[#allocation7 + $0x938] sm:$0xff]  ;;  %v2985_v32 = vpack.c.bf16 %v1256_v29, %v1255_v27  ;;  %v1317_v27 = vld [vmem:[#allocation7 + $0x9e0] sm:$0xff] }
 0x2b8   : > { %2936 = vmatprep.subr.bf16.mxu0 %v2935_v51  ;;  %v2999_v49 = vpack.c.bf16 %v1296_v46, %v1295_v44  ;;  %v1614_v17 = vld [vmem:[#allocation7 + $0xb38] sm:$0xff] }
 0x2b9   : > { %2966 = vmatpush3.bf16.msra.mxu1 %v2965_v33  ;;  %v3015_v33 = vpack.c.bf16 %v1304_v31, %v1303_v30  ;;  %v1319_v30 = vld [vmem:[#allocation7 + $0x9f0] sm:$0xff]  ;;  %v1320_v31 = vld [vmem:[#allocation7 + $0x9f8] sm:$0xff] }
 0x2ba   : > { %2968 = vmatprep.subr.bf16.mxu1 %v2967_v41 }
 0x2bb   : > { %2938 = vmatpush3.bf16.msra.mxu0 %v2935_v51  ;;  %v1265_v51 = vld [vmem:[#allocation7 + $0x840] sm:$0xff] }
 0x2bc   : > { %2940 = vmatprep.subr.bf16.mxu0 %v2939_v55  ;;  %v2971_v53 = vpack.c.bf16 %v1266_v52, %v1265_v51 }
 0x2bd   : > { %2970 = vmatpush3.bf16.msra.mxu1 %v2969_v45 }
 0x2be   : > { %2972 = vmatprep.subr.bf16.mxu1 %v2971_v53 }
 0x2bf   : > { %2942 = vmatpush3.bf16.msra.mxu0 %v2939_v55  ;;  %v1249_v55 = vld [vmem:[#allocation7 + $0x7c0] sm:$0xff] }
 0x2c0   : > { %2944 = vmatprep.subr.bf16.mxu0 %v2943_v59 }
 0x2c3   : > { %2946 = vmatpush3.bf16.msra.mxu0 %v2943_v59  ;;  %v2973_v59 = vpack.c.bf16 %v1250_v57, %v1249_v55  ;;  %v1213_v55 = vld [vmem:[#allocation9 + $0x4] sm:$0x3] }
 0x2c4   : > { %2948 = vmatprep.subr.bf16.mxu0 %v2947_v62  ;;  %v1217_v57 = vrot.slane %v1213_v55, %v3622_v54  ;;  %v1223_v60 = vrot.slane %v1213_v55, %v3624_v56  ;;  %v1609_v55 = vld [vmem:[#allocation7 + $0xb10] sm:$0xff] }
 0x2c5   : > { %2974 = vmatpush3.bf16.msra.mxu1 %v2973_v59 }
 0x2c7   : > { %2950 = vmatpush3.bf16.msra.mxu0 %v2947_v62  ;;  %v1282_v62 = vld [vmem:[#allocation7 + $0x8c8] sm:$0xff] }
 0x2c8   : > { %2952 = vmatprep.subr.bf16.mxu0 %v2951_v1  ;;  %v3005_v0 = vpack.c.bf16 %v1282_v62, %v1281_v61 }
 0x2cb   : > { %2954 = vmatpush3.bf16.msra.mxu0 %v2951_v1  ;;  %v1267_v1 = vld [vmem:[#allocation7 + $0x850] sm:$0xff] }
 0x2cc   : > { %2988 = vmatprep.subr.bf16.mxu0 %v2987_v11  ;;  %v3007_v11 = vpack.c.bf16 %v1300_v8, %v1299_v6  ;;  %v1308_v6 = vld [vmem:[#allocation7 + $0x998] sm:$0xff] }
 0x2cd   : > { %v3023_v10 = vpack.c.bf16 %v1308_v6, %v1307_v5  ;;  %v1612_v5 = vld [vmem:[#allocation7 + $0xb28] sm:$0xff] }
 0x2ce   : > { %2595 = vmatmul.mubr.f32.vlgmr.msra.gmra.mrb[14].mxu0 %v905_v2  ;;  %v1268_v2 = vld [vmem:[#allocation7 + $0x858] sm:$0xff] }
 0x2cf   : > { %2990 = vmatpush3.bf16.msra.mxu0 %v2989_v15  ;;  %v2975_v3 = vpack.c.bf16 %v1268_v2, %v1267_v1  ;;  %v2979_v15 = vpack.c.bf16 %v1270_v14, %v1269_v13 }
 0x2d0   : > { %2992 = vmatprep.subr.bf16.mxu0 %v2991_v25  ;;  %v1271_v25 = vld [vmem:[#allocation7 + $0x870] sm:$0xff] }
 0x2d1   : > { %2976 = vmatprep.subr.bf16.mxu1 %v2975_v3 }
 0x2d2   : > { %2978 = vmatpush3.bf16.msra.mxu1 %v2977_v7 }
 0x2d3   : > { %2994 = vmatpush3.bf16.msra.mxu0 %v2993_v26  ;;  %2980 = vmatprep.subr.bf16.mxu1 %v2979_v15  ;;  %v1272_v26 = vld [vmem:[#allocation7 + $0x878] sm:$0xff] }
 0x2d4   : > { %2996 = vmatprep.subr.bf16.mxu0 %v2995_v37  ;;  %v2983_v28 = vpack.c.bf16 %v1272_v26, %v1271_v25  ;;  %v1305_v37 = vld [vmem:[#allocation7 + $0x980] sm:$0xff]  ;;  %v1316_v25 = vld [vmem:[#allocation7 + $0x9d8] sm:$0xff] }
 0x2d6   : > { %2982 = vmatpush3.bf16.msra.mxu1 %v2981_v19 }
 0x2d7   : > { %2998 = vmatpush3.bf16.msra.mxu0 %v2997_v38  ;;  %2984 = vmatprep.subr.bf16.mxu1 %v2983_v28  ;;  %v1306_v38 = vld [vmem:[#allocation7 + $0x988] sm:$0xff] }
 0x2d8   : > { %3000 = vmatprep.subr.bf16.mxu0 %v2999_v49  ;;  %v3019_v39 = vpack.c.bf16 %v1306_v38, %v1305_v37  ;;  %v1318_v28 = vld [vmem:[#allocation7 + $0x9e8] sm:$0xff]  ;;  %v3051_v37 = vpack.c.bf16 %v1592_v35, %v1591_v34  ;;  %v1585_v35 = vld [vmem:[#allocation7 + $0xa50] sm:$0xff] }
 0x2d9   : > { %v3043_v29 = vpack.c.bf16 %v1318_v28, %v1317_v27  ;;  %v1576_v38 = vld [vmem:[#allocation7 + $0xa08] sm:$0xff]  ;;  %v1615_v28 = vld [vmem:[#allocation7 + $0xb40] sm:$0xff] }
 0x2da   : > { %2986 = vmatpush3.bf16.msra.mxu1 %v2985_v32  ;;  %v3047_v32 = vpack.c.bf16 %v1320_v31, %v1319_v30  ;;  %v1632_v27 = vld [vmem:[#allocation7 + $0xbc8] sm:$0xff] }
 0x2db   : > { %3002 = vmatpush3.bf16.msra.mxu0 %v3001_v50  ;;  %3020 = vmatprep.subr.bf16.mxu1 %v3019_v39 }
 0x2dc   : > { %3004 = vmatprep.subr.bf16.mxu0 %v3003_v63 }
 0x2df   : > { %3006 = vmatpush3.bf16.msra.mxu0 %v3005_v0 }
 0x2e0   : > { %3008 = vmatprep.subr.bf16.mxu0 %v3007_v11  ;;  %v1309_v11 = vld [vmem:[#allocation7 + $0x9a0] sm:$0xff] }
 0x2e3   : > { %3010 = vmatpush3.bf16.msra.mxu0 %v3009_v12  ;;  %v1310_v12 = vld [vmem:[#allocation7 + $0x9a8] sm:$0xff] }
 0x2e4   : > { %3012 = vmatprep.subr.bf16.mxu0 %v3011_v23  ;;  %v3027_v15 = vpack.c.bf16 %v1310_v12, %v1309_v11  ;;  %v3035_v23 = vpack.c.bf16 %v1314_v22, %v1313_v21  ;;  %v1581_v11 = vld [vmem:[#allocation7 + $0xa30] sm:$0xff]  ;;  %v1582_v12 = vld [vmem:[#allocation7 + $0xa38] sm:$0xff]  ;;  %v1600_v21 = vld [vmem:[#allocation7 + $0xac8] sm:$0xff] }
 0x2e7   : > { %3014 = vmatpush3.bf16.msra.mxu0 %v3013_v24  ;;  %v1315_v24 = vld [vmem:[#allocation7 + $0x9d0] sm:$0xff] }
 0x2e8   : > { %3016 = vmatprep.subr.bf16.mxu0 %v3015_v33  ;;  %v3039_v26 = vpack.c.bf16 %v1316_v25, %v1315_v24  ;;  %v1584_v24 = vld [vmem:[#allocation7 + $0xa48] sm:$0xff]  ;;  %v1631_v25 = vld [vmem:[#allocation7 + $0xbc0] sm:$0xff] }
 0x2e9   : > { %v3099_v30 = vpack.c.bf16 %v1632_v27, %v1631_v25 }
 0x2eb   : > { %3018 = vmatpush3.bf16.msra.mxu0 %v3017_v36  ;;  %v1575_v36 = vld [vmem:[#allocation7 + $0xa00] sm:$0xff] }
 0x2ec   : > { %3052 = vmatprep.subr.bf16.mxu0 %v3051_v37  ;;  %v1633_v37 = vld [vmem:[#allocation7 + $0xbd0] sm:$0xff] }
 0x381   : > { %v2242_v40 = vpop.f32.mrb[10].mxu0  ;;  %v2280_v41 = vpop.f32.mrb[10].mxu1 }
 0x382   : > { %v2243_v42 = vpop.f32.mrb[11].mxu0  ;;  %v2281_v43 = vpop.f32.mrb[11].mxu1 }
 0x383   : > { %v2244_v44 = vadd.f32 %v2243_v42, %v2242_v40  ;;  %v2282_v45 = vadd.f32 %v2281_v43, %v2280_v41  ;;  %v1624_v40 = vld [vmem:[#allocation7 + $0xb88] sm:$0xff]  ;;  %v3053_v41 = vpack.c.bf16 %v1576_v38, %v1575_v36  ;;  %v1607_v43 = vld [vmem:[#allocation7 + $0xb00] sm:$0xff]  ;;  %v1586_v36 = vld [vmem:[#allocation7 + $0xa58] sm:$0xff] }
 0x384   : > { %v3073_v38 = vpack.c.bf16 %v1586_v36, %v1585_v35  ;;  %v1641_v36 = vld [vmem:[#allocation7 + $0xc10] sm:$0xff] }
 0x385   : > { %v2245_v46 = vpop.f32.mrb[12].mxu0  ;;  %v2283_v47 = vpop.f32.mrb[12].mxu1  ;;  %v1129_v48 = vadd.f32 %v2282_v45, %v2244_v44  ;;  %v1608_v44 = vld [vmem:[#allocation7 + $0xb08] sm:$0xff]  ;;  %v1593_v45 = vld [vmem:[#allocation7 + $0xa90] sm:$0xff] }
 0x386   : > { %v2246_v49 = vpop.f32.mrb[13].mxu0  ;;  %v2284_v50 = vpop.f32.mrb[13].mxu1 }
 0x387   : > { %v2247_v51 = vadd.f32 %v2246_v49, %v2245_v46  ;;  %v2285_v52 = vadd.f32 %v2284_v50, %v2283_v47  ;;  %v3085_v46 = vpack.c.bf16 %v1608_v44, %v1607_v43  ;;  %v1594_v47 = vld [vmem:[#allocation7 + $0xa98] sm:$0xff]  ;;  %v1577_v49 = vld [vmem:[#allocation7 + $0xa10] sm:$0xff]  ;;  %v1603_v44 = vld [vmem:[#allocation7 + $0xae0] sm:$0xff] }
 0x388   : > { %v1578_v50 = vld [vmem:[#allocation7 + $0xa18] sm:$0xff] }
 0x389   : > { %v1134_v53 = vadd.f32 %v2285_v52, %v2247_v51  ;;  %v1625_v51 = vld [vmem:[#allocation7 + $0xb90] sm:$0xff]  ;;  %v3057_v52 = vpack.c.bf16 %v1578_v50, %v1577_v49  ;;  %v1635_v49 = vld [vmem:[#allocation7 + $0xbe0] sm:$0xff] }
 0x3a1   : > { %v2596_v58 = vpop.f32.mrb[14].mxu0 }
 0x3a2   : > { %v1209_v59 = vadd.f32 %v2596_v58, %v1134_v53  ;;  %v1203_v61 = vpop.f32.mrb[15].mxu0  ;;  %v1626_v53 = vld [vmem:[#allocation7 + $0xb98] sm:$0xff] }
 0x3a3   : > { %v1204_v62 = vadd.f32 %v1203_v61, %v1129_v48  ;;  %v3055_v48 = vpack.c.bf16 %v1594_v47, %v1593_v45  ;;  %v3087_v58 = vpack.c.bf16 %v1626_v53, %v1625_v51  ;;  %v1596_v61 = vld [vmem:[#allocation7 + $0xaa8] sm:$0xff]  ;;  %v1587_v47 = vld [vmem:[#allocation7 + $0xa60] sm:$0xff] }
 0x3a4   : > { %v1219_v63 = vmul.f32 %v1217_v57, %v1209_v59  ;;  %v1604_v45 = vld [vmem:[#allocation7 + $0xae8] sm:$0xff] }
 0x3a5   : > { %v1218_v0 = vmul.f32 %v1217_v57, %v1204_v62  ;;  %v1610_v57 = vld [vmem:[#allocation7 + $0xb18] sm:$0xff]  ;;  %v1636_v51 = vld [vmem:[#allocation7 + $0xbe8] sm:$0xff] }
 0x3a6   : > { %v1225_v1 = vadd.f32 %v1223_v60, %v1219_v63  ;;  %v3089_v59 = vpack.c.bf16 %v1610_v57, %v1609_v55  ;;  %v1579_v63 = vld [vmem:[#allocation7 + $0xa20] sm:$0xff]  ;;  %v1620_v53 = vld [vmem:[#allocation7 + $0xb68] sm:$0xff]  ;;  %v3107_v55 = vpack.c.bf16 %v1636_v51, %v1635_v49  ;;  %v1646_v49 = vld [vmem:[#allocation7 + $0xc38] sm:$0xff] }
 0x3a7   : > { %v1224_v2 = vadd.f32 %v1223_v60, %v1218_v0  ;;  %v1595_v60 = vld [vmem:[#allocation7 + $0xaa0] sm:$0xff]  ;;  %v1580_v0 = vld [vmem:[#allocation7 + $0xa28] sm:$0xff] }
 0x3a8   : > { %3229 = vtanh.f32 %v1225_v1  ;;  %v3059_v62 = vpack.c.bf16 %v1596_v61, %v1595_v60  ;;  %v1627_v1 = vld [vmem:[#allocation7 + $0xba0] sm:$0xff]  ;;  %v1589_v60 = vld [vmem:[#allocation7 + $0xa70] sm:$0xff] }
 0x3a9   : > { %3231 = vtanh.f32 %v1224_v2  ;;  %v3061_v2 = vpack.c.bf16 %v1580_v0, %v1579_v63  ;;  %v1637_v63 = vld [vmem:[#allocation7 + $0xbf0] sm:$0xff]  ;;  %v1638_v0 = vld [vmem:[#allocation7 + $0xbf8] sm:$0xff] }
 0x3b2   : > { %v3230_v3 = vpop.eup %3229 }
 0x3b3   : > { %v3232_v4 = vpop.eup %3231  ;;  %1229 = vst [vmem:[#allocation3 + $0x10] sm:$0xff] %v3230_v3 }
 0x3b4   : > { %1228 = vst [vmem:[#allocation3 + $0x8] sm:$0xff] %v3232_v4 }
 0x3ba   : > { %v1237_v14 = vld [vmem:[#allocation3 + $0x11] sm:$0xff] }
 0x3bb   : > { %v1232_v7 = vld [vmem:[#allocation3 + $0x7] sm:$0xff]  ;;  %v1233_v13 = vld [vmem:[#allocation3 + $0xf] sm:$0xff] }
 0x3bc   : > { %v1236_v8 = vld [vmem:[#allocation3 + $0x9] sm:$0xff]  ;;  %1385 = vmatprep.mubr.f32.mxu1 %v1232_v7  ;;  %v1239_v33 = vld [vmem:[#allocation3 + $0x12] sm:$0xff] }
 0x3bd   : > { %v1230_v9 = vld [vmem:[#allocation3 + $0x6] sm:$0xff]  ;;  %1460 = vmatprep.mubr.f32.mxu0 %v1236_v8  ;;  %v1231_v16 = vld [vmem:[#allocation3 + $0xe] sm:$0xff] }
 0x3be   : > { %1386 = vmatmul.mubr.f32.vlgmr.msra.gmra.mrb[14].mxu1 %v1230_v9  ;;  %1461 = vmatmul.mubr.f32.vlgmr.msra.gmra.mrb[16].mxu0 %v3232_v4  ;;  %v1238_v19 = vld [vmem:[#allocation3 + $0xa] sm:$0xff]  ;;  %v1611_v4 = vld [vmem:[#allocation7 + $0xb20] sm:$0xff]  ;;  %v1598_v9 = vld [vmem:[#allocation7 + $0xab8] sm:$0xff] }
 0x3bf   : > { %3022 = vmatpush3.bf16.msra.mxu1 %v3019_v39  ;;  %1390 = vmatprep.mubr.f32.mxu1 %v1233_v13  ;;  %v1623_v39 = vld [vmem:[#allocation7 + $0xb80] sm:$0xff]  ;;  %v3093_v7 = vpack.c.bf16 %v1612_v5, %v1611_v4  ;;  %v1597_v8 = vld [vmem:[#allocation7 + $0xab0] sm:$0xff]  ;;  %v1622_v4 = vld [vmem:[#allocation7 + $0xb78] sm:$0xff] }
 0x3c0   : > { %1465 = vmatprep.mubr.f32.mxu0 %v1237_v14  ;;  %3024 = vmatprep.subr.bf16.mxu1 %v3023_v10  ;;  %v3083_v42 = vpack.c.bf16 %v1624_v40, %v1623_v39  ;;  %v1629_v13 = vld [vmem:[#allocation7 + $0xbb0] sm:$0xff]  ;;  %v3065_v14 = vpack.c.bf16 %v1582_v12, %v1581_v11  ;;  %v1634_v39 = vld [vmem:[#allocation7 + $0xbd8] sm:$0xff] }
 0x3c1   : > { %3054 = vmatpush3.bf16.msra.mxu0 %v3053_v41  ;;  %v1617_v40 = vld [vmem:[#allocation7 + $0xb50] sm:$0xff]  ;;  %v1618_v41 = vld [vmem:[#allocation7 + $0xb58] sm:$0xff] }
 0x3c2   : > { %1391 = vmatmul.mubr.f32.gmra.mrb[16].mxu1 %v1231_v16  ;;  %1466 = vmatmul.mubr.f32.gmra.mrb[18].mxu0 %v3230_v3  ;;  %v1628_v3 = vld [vmem:[#allocation7 + $0xba8] sm:$0xff]  ;;  %v1613_v16 = vld [vmem:[#allocation7 + $0xb30] sm:$0xff]  ;;  %v3105_v43 = vpack.c.bf16 %v1618_v41, %v1617_v40 }
 0x3c3   : > { %3026 = vmatpush3.bf16.msra.mxu1 %v3023_v10  ;;  %2629 = vmatprep.mubr.f32.mxu1 %v1238_v19  ;;  %v3091_v6 = vpack.c.bf16 %v1628_v3, %v1627_v1  ;;  %v3063_v10 = vpack.c.bf16 %v1598_v9, %v1597_v8  ;;  %v3097_v19 = vpack.c.bf16 %v1614_v17, %v1613_v16  ;;  %v1621_v3 = vld [vmem:[#allocation7 + $0xb70] sm:$0xff] }
 0x3c4   : > { %3028 = vmatprep.subr.bf16.mxu1 %v3027_v15  ;;  %3056 = vmatprep.subr.bf16.mxu0 %v3055_v48  ;;  %v1588_v48 = vld [vmem:[#allocation7 + $0xa68] sm:$0xff]  ;;  %v3113_v5 = vpack.c.bf16 %v1622_v4, %v1621_v3 }
 0x3c5   : > { %3058 = vmatpush3.bf16.msra.mxu0 %v3057_v52  ;;  %v3077_v50 = vpack.c.bf16 %v1588_v48, %v1587_v47  ;;  %v1619_v52 = vld [vmem:[#allocation7 + $0xb60] sm:$0xff]  ;;  %v1645_v48 = vld [vmem:[#allocation7 + $0xc30] sm:$0xff] }
 0x3c6   : > { %3060 = vmatprep.subr.bf16.mxu0 %v3059_v62  ;;  %v3109_v57 = vpack.c.bf16 %v1620_v53, %v1619_v52  ;;  %v1590_v62 = vld [vmem:[#allocation7 + $0xa78] sm:$0xff]  ;;  %v3127_v51 = vpack.c.bf16 %v1646_v49, %v1645_v48  ;;  %v1647_v52 = vld [vmem:[#allocation7 + $0xc40] sm:$0xff]  ;;  %v1648_v53 = vld [vmem:[#allocation7 + $0xc48] sm:$0xff] }
 0x3c7   : > { %3030 = vmatpush3.bf16.msra.mxu1 %v3027_v15  ;;  %v1630_v15 = vld [vmem:[#allocation7 + $0xbb8] sm:$0xff]  ;;  %v3081_v1 = vpack.c.bf16 %v1590_v62, %v1589_v60  ;;  %v1651_v60 = vld [vmem:[#allocation7 + $0xc60] sm:$0xff] }
 0x3c8   : > { %3032 = vmatprep.subr.bf16.mxu1 %v3031_v20  ;;  %v3095_v18 = vpack.c.bf16 %v1630_v15, %v1629_v13 }
 0x3c9   : > { %3062 = vmatpush3.bf16.msra.mxu0 %v3061_v2  ;;  %v3111_v2 = vpack.c.bf16 %v1638_v0, %v1637_v63  ;;  %v1653_v63 = vld [vmem:[#allocation7 + $0xc70] sm:$0xff]  ;;  %v1654_v0 = vld [vmem:[#allocation7 + $0xc78] sm:$0xff] }
 0x3ca   : > { %3064 = vmatprep.subr.bf16.mxu0 %v3063_v10 }
 0x3cb   : > { %3034 = vmatpush3.bf16.msra.mxu1 %v3031_v20  ;;  %v1599_v20 = vld [vmem:[#allocation7 + $0xac0] sm:$0xff] }
 0x3cc   : > { %3036 = vmatprep.subr.bf16.mxu1 %v3035_v23  ;;  %v3067_v22 = vpack.c.bf16 %v1600_v21, %v1599_v20 }
 0x3cd   : > { %3066 = vmatpush3.bf16.msra.mxu0 %v3065_v14 }
 0x3ce   : > { %3068 = vmatprep.subr.bf16.mxu0 %v3067_v22 }
 0x3cf   : > { %3038 = vmatpush3.bf16.msra.mxu1 %v3035_v23  ;;  %v1583_v23 = vld [vmem:[#allocation7 + $0xa40] sm:$0xff] }
 0x3d0   : > { %3040 = vmatprep.subr.bf16.mxu1 %v3039_v26 }
 0x3d3   : > { %3042 = vmatpush3.bf16.msra.mxu1 %v3039_v26  ;;  %v3069_v26 = vpack.c.bf16 %v1584_v24, %v1583_v23  ;;  %v1547_v23 = vld [vmem:[#allocation9 + $0x6] sm:$0x3] }
 0x3d4   : > { %3044 = vmatprep.subr.bf16.mxu1 %v3043_v29  ;;  %v1551_v24 = vrot.slane %v1547_v23, %v3622_v54  ;;  %v1557_v27 = vrot.slane %v1547_v23, %v3624_v56 }
 0x3d5   : > { %3070 = vmatpush3.bf16.msra.mxu0 %v3069_v26 }
 0x3d7   : > { %3046 = vmatpush3.bf16.msra.mxu1 %v3043_v29  ;;  %v1616_v29 = vld [vmem:[#allocation7 + $0xb48] sm:$0xff] }
 0x3d8   : > { %3048 = vmatprep.subr.bf16.mxu1 %v3047_v32  ;;  %v3101_v31 = vpack.c.bf16 %v1616_v29, %v1615_v28 }
 0x3db   : > { %3050 = vmatpush3.bf16.msra.mxu1 %v3047_v32  ;;  %v1601_v32 = vld [vmem:[#allocation7 + $0xad0] sm:$0xff] }
 0x3dc   : > { %3084 = vmatprep.subr.bf16.mxu1 %v3083_v42  ;;  %v3103_v42 = vpack.c.bf16 %v1634_v39, %v1633_v37  ;;  %v1642_v37 = vld [vmem:[#allocation7 + $0xc18] sm:$0xff] }
 0x3dd   : > { %v3119_v41 = vpack.c.bf16 %v1642_v37, %v1641_v36 }
 0x3de   : > { %2630 = vmatmul.mubr.f32.vlgmr.msra.gmra.mrb[18].mxu1 %v1239_v33  ;;  %v1602_v33 = vld [vmem:[#allocation7 + $0xad8] sm:$0xff] }
 0x3df   : > { %3086 = vmatpush3.bf16.msra.mxu1 %v3085_v46  ;;  %v3071_v34 = vpack.c.bf16 %v1602_v33, %v1601_v32  ;;  %v3075_v46 = vpack.c.bf16 %v1604_v45, %v1603_v44 }
 0x3e0   : > { %3088 = vmatprep.subr.bf16.mxu1 %v3087_v58  ;;  %v1605_v58 = vld [vmem:[#allocation7 + $0xaf0] sm:$0xff] }
 0x3e1   : > { %3072 = vmatprep.subr.bf16.mxu0 %v3071_v34 }
 0x3e2   : > { %3074 = vmatpush3.bf16.msra.mxu0 %v3073_v38 }
 0x3e3   : > { %3090 = vmatpush3.bf16.msra.mxu1 %v3089_v59  ;;  %3076 = vmatprep.subr.bf16.mxu0 %v3075_v46  ;;  %v1606_v59 = vld [vmem:[#allocation7 + $0xaf8] sm:$0xff] }
 0x3e4   : > { %3092 = vmatprep.subr.bf16.mxu1 %v3091_v6  ;;  %v3079_v61 = vpack.c.bf16 %v1606_v59, %v1605_v58  ;;  %v1639_v6 = vld [vmem:[#allocation7 + $0xc00] sm:$0xff]  ;;  %v1650_v58 = vld [vmem:[#allocation7 + $0xc58] sm:$0xff] }
 0x3e6   : > { %3078 = vmatpush3.bf16.msra.mxu0 %v3077_v50 }
 0x3e7   : > { %3094 = vmatpush3.bf16.msra.mxu1 %v3093_v7  ;;  %3080 = vmatprep.subr.bf16.mxu0 %v3079_v61  ;;  %v1640_v7 = vld [vmem:[#allocation7 + $0xc08] sm:$0xff] }
 0x3e8   : > { %3096 = vmatprep.subr.bf16.mxu1 %v3095_v18  ;;  %v3115_v8 = vpack.c.bf16 %v1640_v7, %v1639_v6  ;;  %v1652_v61 = vld [vmem:[#allocation7 + $0xc68] sm:$0xff] }
 0x3e9   : > { %v3139_v62 = vpack.c.bf16 %v1652_v61, %v1651_v60 }
 0x3ea   : > { %3082 = vmatpush3.bf16.msra.mxu0 %v3081_v1  ;;  %v3143_v1 = vpack.c.bf16 %v1654_v0, %v1653_v63 }
 0x3eb   : > { %3098 = vmatpush3.bf16.msra.mxu1 %v3097_v19  ;;  %3116 = vmatprep.subr.bf16.mxu0 %v3115_v8 }
 0x3ec   : > { %3100 = vmatprep.subr.bf16.mxu1 %v3099_v30 }
 0x3ef   : > { %3102 = vmatpush3.bf16.msra.mxu1 %v3101_v31 }
 0x3f0   : > { %3104 = vmatprep.subr.bf16.mxu1 %v3103_v42  ;;  %v1643_v42 = vld [vmem:[#allocation7 + $0xc20] sm:$0xff] }
 0x3f3   : > { %3106 = vmatpush3.bf16.msra.mxu1 %v3105_v43  ;;  %v1644_v43 = vld [vmem:[#allocation7 + $0xc28] sm:$0xff] }
 0x3f4   : > { %3108 = vmatprep.subr.bf16.mxu1 %v3107_v55  ;;  %v3123_v46 = vpack.c.bf16 %v1644_v43, %v1643_v42  ;;  %v3131_v55 = vpack.c.bf16 %v1648_v53, %v1647_v52 }
 0x3f7   : > { %3110 = vmatpush3.bf16.msra.mxu1 %v3109_v57  ;;  %v1649_v57 = vld [vmem:[#allocation7 + $0xc50] sm:$0xff] }
 0x3f8   : > { %3112 = vmatprep.subr.bf16.mxu1 %v3111_v2  ;;  %v3135_v59 = vpack.c.bf16 %v1650_v58, %v1649_v57 }
 0x3fb   : > { %3114 = vmatpush3.bf16.msra.mxu1 %v3113_v5 }
 0x491   : > { %v2336_v9 = vpop.f32.mrb[14].mxu1  ;;  %v2374_v10 = vpop.f32.mrb[16].mxu0 }
 0x492   : > { %v2337_v11 = vpop.f32.mrb[15].mxu1  ;;  %v2375_v12 = vpop.f32.mrb[17].mxu0 }
 0x493   : > { %v2338_v13 = vadd.f32 %v2337_v11, %v2336_v9  ;;  %v2376_v14 = vadd.f32 %v2375_v12, %v2374_v10 }
 0x495   : > { %v2339_v15 = vpop.f32.mrb[16].mxu1  ;;  %v2377_v16 = vpop.f32.mrb[18].mxu0  ;;  %v1463_v17 = vadd.f32 %v2376_v14, %v2338_v13 }
 0x496   : > { %v2340_v18 = vpop.f32.mrb[17].mxu1  ;;  %v2378_v19 = vpop.f32.mrb[19].mxu0 }
 0x497   : > { %v2341_v20 = vadd.f32 %v2340_v18, %v2339_v15  ;;  %v2379_v21 = vadd.f32 %v2378_v19, %v2377_v16 }
 0x499   : > { %v1468_v22 = vadd.f32 %v2379_v21, %v2341_v20 }
 0x4b1   : > { %v2631_v25 = vpop.f32.mrb[18].mxu1 }
 0x4b2   : > { %v1543_v26 = vadd.f32 %v2631_v25, %v1468_v22  ;;  %v1537_v28 = vpop.f32.mrb[19].mxu1 }
 0x4b3   : > { %v1538_v29 = vadd.f32 %v1537_v28, %v1463_v17  ;;  %v1881_v17 = vld [vmem:[#allocation9 + $0x8] sm:$0x3] }
 0x4b4   : > { %v1553_v30 = vmul.f32 %v1551_v24, %v1543_v26  ;;  %v1885_v18 = vrot.slane %v1881_v17, %v3622_v54  ;;  %v1891_v21 = vrot.slane %v1881_v17, %v3624_v56 }
 0x4b5   : > { %v1552_v31 = vmul.f32 %v1551_v24, %v1538_v29 }
 0x4b6   : > { %v1559_v32 = vadd.f32 %v1557_v27, %v1553_v30 }
 0x4b7   : > { %v1558_v33 = vadd.f32 %v1557_v27, %v1552_v31 }
 0x4b8   : > { %3233 = vtanh.f32 %v1559_v32 }
 0x4b9   : > { %3235 = vtanh.f32 %v1558_v33 }
 0x4c2   : > { %v3234_v34 = vpop.eup %3233 }
 0x4c3   : > { %v3236_v35 = vpop.eup %3235  ;;  %1563 = vst [vmem:[#allocation2 + $0x10] sm:$0xff] %v3234_v34 }
 0x4c4   : > { %1562 = vst [vmem:[#allocation2 + $0x8] sm:$0xff] %v3236_v35 }
 0x4ca   : > { %v1571_v45 = vld [vmem:[#allocation2 + $0x11] sm:$0xff] }
 0x4cb   : > { %v1566_v38 = vld [vmem:[#allocation2 + $0x7] sm:$0xff]  ;;  %v1567_v44 = vld [vmem:[#allocation2 + $0xf] sm:$0xff] }
 0x4cc   : > { %v1570_v39 = vld [vmem:[#allocation2 + $0x9] sm:$0xff]  ;;  %1719 = vmatprep.mubr.f32.mxu0 %v1566_v38  ;;  %v1573_v2 = vld [vmem:[#allocation2 + $0x12] sm:$0xff] }
 0x4cd   : > { %v1564_v40 = vld [vmem:[#allocation2 + $0x6] sm:$0xff]  ;;  %1794 = vmatprep.mubr.f32.mxu1 %v1570_v39  ;;  %v1565_v47 = vld [vmem:[#allocation2 + $0xe] sm:$0xff] }
 0x4ce   : > { %1720 = vmatmul.mubr.f32.vlgmr.msra.gmra.mrb[20].mxu0 %v1564_v40  ;;  %1795 = vmatmul.mubr.f32.vlgmr.msra.gmra.mrb[20].mxu1 %v3236_v35  ;;  %v1572_v50 = vld [vmem:[#allocation2 + $0xa] sm:$0xff] }
 0x4cf   : > { %3118 = vmatpush3.bf16.msra.mxu0 %v3115_v8  ;;  %1724 = vmatprep.mubr.f32.mxu0 %v1567_v44 }
 0x4d0   : > { %1799 = vmatprep.mubr.f32.mxu1 %v1571_v45  ;;  %3120 = vmatprep.subr.bf16.mxu0 %v3119_v41 }
 0x4d2   : > { %1725 = vmatmul.mubr.f32.gmra.mrb[22].mxu0 %v1565_v47  ;;  %1800 = vmatmul.mubr.f32.gmra.mrb[22].mxu1 %v3234_v34 }
 0x4d3   : > { %3122 = vmatpush3.bf16.msra.mxu0 %v3119_v41  ;;  %2664 = vmatprep.mubr.f32.mxu0 %v1572_v50 }
 0x4d4   : > { %3124 = vmatprep.subr.bf16.mxu0 %v3123_v46 }
 0x4d7   : > { %3126 = vmatpush3.bf16.msra.mxu0 %v3123_v46 }
 0x4d8   : > { %3128 = vmatprep.subr.bf16.mxu0 %v3127_v51 }
 0x4db   : > { %3130 = vmatpush3.bf16.msra.mxu0 %v3127_v51 }
 0x4dc   : > { %3132 = vmatprep.subr.bf16.mxu0 %v3131_v55 }
 0x4df   : > { %3134 = vmatpush3.bf16.msra.mxu0 %v3131_v55 }
 0x4e0   : > { %3136 = vmatprep.subr.bf16.mxu0 %v3135_v59 }
 0x4e3   : > { %3138 = vmatpush3.bf16.msra.mxu0 %v3135_v59 }
 0x4e4   : > { %3140 = vmatprep.subr.bf16.mxu0 %v3139_v62 }
 0x4e7   : > { %3142 = vmatpush3.bf16.msra.mxu0 %v3139_v62 }
 0x4e8   : > { %3144 = vmatprep.subr.bf16.mxu0 %v3143_v1 }
 0x4eb   : > { %3146 = vmatpush3.bf16.msra.mxu0 %v3143_v1 }
 0x4ee   : > { %2665 = vmatmul.mubr.f32.vlgmr.msra.gmra.mrb[24].mxu0 %v1573_v2 }
 0x5a1   : > { %v2430_v3 = vpop.f32.mrb[20].mxu0  ;;  %v2468_v4 = vpop.f32.mrb[20].mxu1 }
 0x5a2   : > { %v2431_v5 = vpop.f32.mrb[21].mxu0  ;;  %v2469_v6 = vpop.f32.mrb[21].mxu1 }
 0x5a3   : > { %v2432_v7 = vadd.f32 %v2431_v5, %v2430_v3  ;;  %v2470_v8 = vadd.f32 %v2469_v6, %v2468_v4 }
 0x5a5   : > { %v2433_v9 = vpop.f32.mrb[22].mxu0  ;;  %v2471_v10 = vpop.f32.mrb[22].mxu1  ;;  %v1797_v11 = vadd.f32 %v2470_v8, %v2432_v7 }
 0x5a6   : > { %v2434_v12 = vpop.f32.mrb[23].mxu0  ;;  %v2472_v13 = vpop.f32.mrb[23].mxu1 }
 0x5a7   : > { %v2435_v14 = vadd.f32 %v2434_v12, %v2433_v9  ;;  %v2473_v15 = vadd.f32 %v2472_v13, %v2471_v10 }
 0x5a9   : > { %v1802_v16 = vadd.f32 %v2473_v15, %v2435_v14 }
 0x5c1   : > { %v2666_v19 = vpop.f32.mrb[24].mxu0 }
 0x5c2   : > { %v1877_v20 = vadd.f32 %v2666_v19, %v1802_v16  ;;  %v1871_v22 = vpop.f32.mrb[25].mxu0 }
 0x5c3   : > { %v1872_v23 = vadd.f32 %v1871_v22, %v1797_v11 }
 0x5c4   : > { %v1887_v24 = vmul.f32 %v1885_v18, %v1877_v20 }
 0x5c5   : > { %v1886_v25 = vmul.f32 %v1885_v18, %v1872_v23 }
 0x5c6   : > { %v1893_v54 = vadd.f32 %v1891_v21, %v1887_v24 }
 0x5c7   : > { %v1892_v56 = vadd.f32 %v1891_v21, %v1886_v25 }
 0x5c8   : > { %1895 = vst [vmem:[%s217_s18 + $0x8] sm:$0xff] %v1893_v54 }
 0x5c9   : > { %1894 = vst [vmem:[%s217_s18] sm:$0xff] %v1892_v56 }
 0x5ca   : > { %3336 = shalt.err (!%p3333_p1)
}
 0x5cb   : > { %s3337_s23 = scalar_lea.hbm %s3644_s22, 256  ;;  %s3341_s28 = scalar_lea.hbm %s3691_s3, 512 }
 0x5cc   : > { %p3338_p13 = scmp.ne.s32.totalorder %s3644_s22, %s3337_s23  ;;  %p3342_p4 = scmp.lt.u32.totalorder %s3644_s22, %s3691_s3 }
 0x5cd   : > { %p3343_p7 = scmp.lt.u32.totalorder %s3341_s28, %s3337_s23  ;;  %p3345_p11 = scmp.lt.u32.totalorder %s3337_s23, %s3644_s22 }
 0x5ce   : > { %p3339_p6 = pnand %p3338_p13, %p3705_p0 }
 0x5cf   : > { %p3344_p8 = por %p3343_p7, %p3342_p4 }
 0x5d0   : > { %p3340_p10 = pneg %p3339_p6 }
 0x5d1   : > { %p3346_p2 = por %p3345_p11, %p3344_p8 }
 0x5d3   : > { %p3347_p3 = pnand %p3346_p2, %p3340_p10 }
 0x5d5   : > { %3350 = shalt.err (!%p3347_p3)
}
 0x5d6   : > { %s3404_s29 = smov 128   ;;  %s3405_s18 = smov 8  }
 0x5d7   : > { %3157 = dma.vmem_to_hbm [thread:$0]  (%p3705_p0), %s3639_s20, 256, %s3644_s22, %s1897_s30, %s3404_s29, %s3404_s29, %s3405_s18  }
 0x5d8 PF: > { %s1925_s7 = sand.u32 1, %s3381_s12   ;;  %p3706_p5 = scmp.ne.s32.totalorder %s3696_s19, 0 }
 0x5d9   : > { %p3707_p9 = scmp.ge.s32.totalorder %s3393_s15, 2  ;;  %s1926_s8 = scalar_lea.sflag [#allocation6], %s1925_s7 }
 0x5db   : > { %p3171_p12 = pnand %p3707_p9, %p3706_p5 }
 0x5dd   : > { %3376 = dma.done.wait (!%p3171_p12), %s1926_s8, 256  }
 0x5de   : > { %3378 = vsyncadd (!%p3171_p12), %s1926_s8, 4294967040  ;;  %p17_p1 = scmp.ge.s32.totalorder %s3539_s6, 4   ;;  %s3708_s12 = smov %s3385_s13 }
 0x5df   : > { %s3709_s13 = smov %s3389_s14  ;;  %s3710_s14 = smov %s3548_s11 }
 0x5e0   : > { %s3711_s15 = smov %s3539_s6  ;;  %19 = sbr.rel (!%p17_p1) target bundleno = 6 (0x6), region = 93 }
 0x5e7   :  { %1931 = vsyncpa [#allocation5], 1 }
 0x5e8   :  { %1933 = vsyncpa [#allocation5 + $0x1], 1 }
 0x5e9   :  { %1934 = vsyncpa [#allocation8], 1 }
 0x5ea   :  { %1935 = vsyncpa [#allocation6], 1 }
 0x5eb   :  { %1937 = vsyncpa [#allocation6 + $0x1], 1 }

</bundles_post_ra>
